<compile_context>
chip_gen: v6e
topology: v6e:2x2x1
jax: 0.10.0
libtpu: 0.0.40
codegen_flags: <defaults>
</compile_context>

<pallas_src>
import jax
import jax.numpy as jnp
from jax import lax
from jax.experimental import pallas as pl
from jax.experimental.pallas import tpu as pltpu

# ----------------------------- config ---------------------------------------
VOCAB = 256
D_MODEL = 64
N_HEADS = 2
HEAD_DIM = D_MODEL // N_HEADS
FFN = 128
N_LAYERS = 2
LORA_R = 8
LORA_ALPHA = 32
LORA_SCALE = LORA_ALPHA / LORA_R
PAD_ID = 0
BOS_ID = 1
RMS_EPS = 1e-6
ATTN_SCALE = 1.0 / (HEAD_DIM ** 0.5)
NEG_INF = -1e30
# TODO(synk): tokenizer, HF checkpoint loading, prompt templating and LoRA
#             dropout (p=0.1; a no-op in eval) have no Pallas equivalent — a
#             synthetic tiny LLaMA decoder is used instead.


# ----------------------------- in-kernel helpers -----------------------------
def _rmsnorm(x, w):
    var = jnp.mean(x * x, axis=-1, keepdims=True)
    return x * lax.rsqrt(var + RMS_EPS) * w


# ----------------------------- fused kernel ----------------------------------
def _fused_forward_kernel(x_ref, bias_ref, rope_ref, onehot_ref, norms_ref,
                          wattn_ref, wgulm_ref, wod_ref, loss_ref):
    h = x_ref[...]                            # [BT, D] f32 residual stream
    cos2 = rope_ref[0]                        # [BT, 2D]  (cos | cos)
    sin2 = rope_ref[1]                        # [BT, 2D]  (sin | sin)
    bias = bias_ref[...]                      # [BT, BT] additive mask (0 / -1e30)

    for li in range(N_LAYERS):
        # ---------------- attention block ----------------
        xn = _rmsnorm(h, norms_ref[2 * li])
        xb = xn.astype(jnp.bfloat16)          # single cast reused by fused proj
        # fused (Wq|Wk|Wq@R|Wk@R|Wv) projection, LoRA already folded in
        proj = jnp.dot(xb, wattn_ref[li],
                       preferred_element_type=jnp.float32)        # [BT, 5D]
        # RoPE: rotation matrix folded into weight columns -> two aligned FMAs
        qk = proj[:, :2 * D_MODEL] * cos2 + proj[:, 2 * D_MODEL:4 * D_MODEL] * sin2
        qkb = qk.astype(jnp.bfloat16)                             # [BT, 2D]
        vb = proj[:, 4 * D_MODEL:5 * D_MODEL].astype(jnp.bfloat16)  # [BT, D]

        attn_out = None
        for hh in range(N_HEADS):
            sl = slice(hh * HEAD_DIM, (hh + 1) * HEAD_DIM)
            qh = qkb[:, sl]
            kh = qkb[:, D_MODEL + hh * HEAD_DIM: D_MODEL + (hh + 1) * HEAD_DIM]
            vh = vb[:, sl]
            s = lax.dot_general(qh, kh, (((1,), (1,)), ((), ())),
                                preferred_element_type=jnp.float32)
            s = s * ATTN_SCALE + bias                              # [BT, BT]
            smax = jnp.max(s, axis=-1, keepdims=True)
            e = jnp.exp(s - smax)
            denom = jnp.sum(e, axis=-1, keepdims=True)
            p = (e * pl.reciprocal(denom, approx=True)).astype(jnp.bfloat16)
            ctx = jnp.dot(p, vh, preferred_element_type=jnp.float32)  # [BT, hd]
            # accumulate through Wo row-slice -> no head concat
            part = jnp.dot(ctx.astype(jnp.bfloat16), wod_ref[li, sl, :],
                           preferred_element_type=jnp.float32)        # [BT, D]
            attn_out = part if attn_out is None else attn_out + part
        h = h + attn_out

        # ---------------- SwiGLU MLP block ----------------
        xn = _rmsnorm(h, norms_ref[2 * li + 1])
        xb = xn.astype(jnp.bfloat16)
        gu = jnp.dot(xb, wgulm_ref[li],
                     preferred_element_type=jnp.float32)          # [BT, 2*FFN]
        g = gu[:, :FFN]                                            # aligned split
        u = gu[:, FFN:]
        act = (g * jax.nn.sigmoid(g) * u).astype(jnp.bfloat16)
        h = h + jnp.dot(act, wod_ref[li, D_MODEL:D_MODEL + FFN, :],
                        preferred_element_type=jnp.float32)

    # ---------- final norm + lm_head + shifted CE (logits stay in VMEM) -------
    hn = _rmsnorm(h, norms_ref[2 * N_LAYERS]).astype(jnp.bfloat16)
    logits = jnp.dot(hn, wgulm_ref[N_LAYERS],
                     preferred_element_type=jnp.float32)          # [BT, V]
    mx = jnp.max(logits, axis=-1, keepdims=True)
    e = jnp.exp(logits - mx)
    lse = jnp.log(jnp.sum(e, axis=-1, keepdims=True)) + mx        # [BT, 1]
    oh = onehot_ref[...]                                          # [BT, V]
    tgt = jnp.sum(logits * oh, axis=-1, keepdims=True)            # [BT, 1]
    valid = jnp.sum(oh, axis=-1, keepdims=True)                   # 1 if labeled
    per_tok = lse * valid - tgt
    loss_ref[...] = jnp.sum(per_tok, axis=(0, 1), keepdims=True)  # [1, 1]


# ----------------------------- wrapper / glue ---------------------------------
def rope_tables(t, hd):
    inv_freq = 1.0 / (10000.0 ** (jnp.arange(0, hd, 2, dtype=jnp.float32) / hd))
    freqs = jnp.arange(t, dtype=jnp.float32)[:, None] * inv_freq[None, :]
    cos_h = jnp.concatenate([jnp.cos(freqs), jnp.cos(freqs)], axis=-1)  # [T, hd]
    sin_h = jnp.concatenate([jnp.sin(freqs), jnp.sin(freqs)], axis=-1)  # [T, hd]
    return jnp.tile(cos_h, (1, N_HEADS)), jnp.tile(sin_h, (1, N_HEADS))  # [T, D]


def _rotate_half_matrix():
    """Per-head HF rotate_half as a signed permutation matrix, block-diag over heads."""
    half = HEAD_DIM // 2
    r = jnp.zeros((HEAD_DIM, HEAD_DIM), jnp.float32)
    idx = jnp.arange(half)
    r = r.at[idx + half, idx].set(-1.0)   # (q @ R)[i]        = -q[i+half], i < half
    r = r.at[idx, idx + half].set(1.0)    # (q @ R)[i+half]   =  q[i]
    return jnp.kron(jnp.eye(N_HEADS, dtype=jnp.float32), r)   # [D, D]


def _pack_weights(params):
    """Fold LoRA + rotate-half into weights and pack everything into 4 slabs."""
    assert VOCAB == 2 * FFN, "lm_head is packed into the gate|up slab"
    bf16 = jnp.bfloat16
    R = _rotate_half_matrix()

    w_attn, w_gu, w_od, norms = [], [], [], []
    for p in params["layers"]:
        wq = p["wq"] + LORA_SCALE * (p["wq_a"] @ p["wq_b"])
        wv = p["wv"] + LORA_SCALE * (p["wv_a"] @ p["wv_b"])
        wk = p["wk"]
        # columns: [Wq | Wk | Wq@R | Wk@R | Wv]  -> RoPE via two aligned FMAs
        w_attn.append(jnp.concatenate([wq, wk, wq @ R, wk @ R, wv], axis=1))
        w_gu.append(jnp.concatenate([p["wg"], p["wu"]], axis=1))        # [D, 2F]
        w_od.append(jnp.concatenate([p["wo"], p["wd"]], axis=0))        # [D+F, D]
        norms.append(p["ln1_w"].reshape(1, -1))
        norms.append(p["ln2_w"].reshape(1, -1))
    norms.append(params["final_norm"].reshape(1, -1))
    w_gu.append(params["lm_head"])                                       # [D, V]

    return dict(
        w_attn=jnp.stack(w_attn).astype(bf16),          # [L, D, 5D]
        w_gu_lm=jnp.stack(w_gu).astype(bf16),            # [L+1, D, 2F]
        w_od=jnp.stack(w_od).astype(bf16),               # [L, D+F, D]
        norms=jnp.stack(norms).astype(jnp.float32),      # [2L+1, 1, D]
    )


def filler_llm_forward(params, prompt_ids, prompt_mask, text_ids, text_mask):
    """Reproduces FillerLLM.forward loss computation on a synthetic tiny LLaMA."""
    b, lp = prompt_ids.shape
    emb = params["embed"]                                      # [V, D]

    speech_embeds = jnp.take(emb, prompt_ids, axis=0)          # [B, Lp, D]
    to_regress_embeds = jnp.take(emb, text_ids, axis=0)        # [B, Lt, D]
    bos_ids = jnp.full((b, 1), BOS_ID, dtype=jnp.int32)
    bos_embeds = jnp.take(emb, bos_ids, axis=0)                # [B, 1, D]

    inputs_embeds = jnp.concatenate(
        [bos_embeds, speech_embeds, to_regress_embeds], axis=1
    ).astype(jnp.float32)                                      # [B, T, D]
    atts_bos = prompt_mask[:, :1]
    attention_mask = jnp.concatenate(
        [atts_bos, prompt_mask, text_mask], axis=1).astype(jnp.float32)  # [B, T]

    # labels: bos + prompt = -100, padded text tokens = -100
    text_targets = jnp.where(text_ids == PAD_ID, -100, text_ids)
    empty_targets = jnp.full((b, lp + 1), -100, dtype=jnp.int32)
    targets = jnp.concatenate([empty_targets, text_targets], axis=1)     # [B, T]

    t = inputs_embeds.shape[1]
    bt = b * t

    # HF causal-LM shift done up front: position i predicts targets[i+1].
    shifted = jnp.concatenate(
        [targets[:, 1:], jnp.full((b, 1), -100, jnp.int32)], axis=1)
    labels_flat = shifted.astype(jnp.int32).reshape(bt)

    # lane-dense one-hot targets (rows with label -100 stay all-zero) + count
    onehot = (labels_flat[:, None] ==
              jnp.arange(VOCAB, dtype=jnp.int32)[None, :]).astype(jnp.float32)
    count = jnp.sum((labels_flat != -100).astype(jnp.float32))

    # additive attention bias for the flat [B*T] slab:
    # block-diagonal per example AND causal AND key-not-padded.
    rows = jnp.arange(bt, dtype=jnp.int32)
    ex = rows // t
    pos = rows % t
    key_valid = attention_mask.reshape(bt) > 0.5
    allow = ((ex[:, None] == ex[None, :]) &
             (pos[None, :] <= pos[:, None]) &
             key_valid[None, :])
    # BOS key of each example is never padded -> no fully-masked softmax row.
    attn_bias = jnp.where(allow, 0.0, NEG_INF).astype(jnp.float32)

    # RoPE tables tiled over batch and duplicated for the fused [q|k] slab.
    cos_d, sin_d = rope_tables(t, HEAD_DIM)                    # [T, D]
    cos_bt = jnp.tile(cos_d, (b, 1))                           # [BT, D]
    sin_bt = jnp.tile(sin_d, (b, 1))
    rope = jnp.stack([jnp.concatenate([cos_bt, cos_bt], axis=-1),
                      jnp.concatenate([sin_bt, sin_bt], axis=-1)])  # [2, BT, 2D]

    w = _pack_weights(params)
    x_flat = inputs_embeds.reshape(bt, D_MODEL)

    def full(shape):
        return pl.BlockSpec(shape, lambda i, _s=shape: (0,) * len(_s))

    loss_sum = pl.pallas_call(
        _fused_forward_kernel,
        out_shape=jax.ShapeDtypeStruct((1, 1), jnp.float32),
        grid=(1,),                                   # single step, flat batch
        in_specs=[
            full((bt, D_MODEL)),                     # flat inputs_embeds
            full((bt, bt)),                          # additive attention bias
            full((2, bt, 2 * D_MODEL)),              # cos|cos, sin|sin
            full((bt, VOCAB)),                       # one-hot shifted labels
            full((2 * N_LAYERS + 1, 1, D_MODEL)),    # ln1/ln2/final norms
            full((N_LAYERS, D_MODEL, 5 * D_MODEL)),  # Wq|Wk|Wq@R|Wk@R|Wv
            full((N_LAYERS + 1, D_MODEL, 2 * FFN)),  # Wg|Wu (+ lm_head slab)
            full((N_LAYERS, D_MODEL + FFN, D_MODEL)),  # Wo ; Wd
        ],
        out_specs=full((1, 1)),
        compiler_params=pltpu.CompilerParams(
            dimension_semantics=("arbitrary",)),
    )(x_flat, attn_bias, rope, onehot, w["norms"],
      w["w_attn"], w["w_gu_lm"], w["w_od"])

    # HF mean over all valid (non -100) shifted positions in the whole batch.
    return loss_sum[0, 0] / count


# ----------------------------- param init ------------------------------------
def init_params(key):
    def nrm(k, shape, scale=0.02):
        return (scale * jax.random.normal(k, shape)).astype(jnp.float32)

    keys = jax.random.split(key, 4 + N_LAYERS)
    params = {
        "embed": nrm(keys[0], (VOCAB, D_MODEL)),
        "lm_head": nrm(keys[1], (D_MODEL, VOCAB)),
        "final_norm": jnp.ones((D_MODEL,), jnp.float32),
        "layers": [],
    }
    for li in range(N_LAYERS):
        lk = jax.random.split(keys[4 + li], 12)
        params["layers"].append({
            "ln1_w": jnp.ones((D_MODEL,), jnp.float32),
            "ln2_w": jnp.ones((D_MODEL,), jnp.float32),
            "wq": nrm(lk[0], (D_MODEL, D_MODEL)),
            "wk": nrm(lk[1], (D_MODEL, D_MODEL)),
            "wv": nrm(lk[2], (D_MODEL, D_MODEL)),
            "wo": nrm(lk[3], (D_MODEL, D_MODEL)),
            "wq_a": nrm(lk[4], (D_MODEL, LORA_R)),
            "wq_b": jnp.zeros((LORA_R, D_MODEL), jnp.float32) + 0.01,
            "wv_a": nrm(lk[5], (D_MODEL, LORA_R)),
            "wv_b": jnp.zeros((LORA_R, D_MODEL), jnp.float32) + 0.01,
            "wg": nrm(lk[6], (D_MODEL, FFN)),
            "wu": nrm(lk[7], (D_MODEL, FFN)),
            "wd": nrm(lk[8], (FFN, D_MODEL)),
        })
    return params


# ----------------------------- main ------------------------------------------
if __name__ == "__main__":
    B, LP, LT = 2, 7, 8            # T = 1 + 7 + 8 = 16, B*T = 32
    key = jax.random.PRNGKey(0)
    k_par, k_p, k_t = jax.random.split(key, 3)

    params = init_params(k_par)

    prompt_ids = jax.random.randint(k_p, (B, LP), 2, VOCAB).astype(jnp.int32)
    text_ids = jax.random.randint(k_t, (B, LT), 2, VOCAB).astype(jnp.int32)

    # second example has right-padding in both prompt and text
    prompt_mask = jnp.ones((B, LP), jnp.float32).at[1, LP - 2:].set(0.0)
    text_mask = jnp.ones((B, LT), jnp.float32).at[1, LT - 3:].set(0.0)
    prompt_ids = jnp.where(prompt_mask > 0, prompt_ids, PAD_ID)
    text_ids = jnp.where(text_mask > 0, text_ids, PAD_ID)

    loss = filler_llm_forward(params, prompt_ids, prompt_mask,
                              text_ids, text_mask)
    loss = jax.block_until_ready(loss)
    assert jnp.isfinite(loss), "loss is not finite"
    print("KERNEL_OK")
</pallas_src>

<mosaic_0001>
module attributes {stable_mosaic.version = 11 : i64} {
  func.func @_fused_forward_kernel(%arg0: i32, %arg1: memref<32x64xf32, #tpu.memory_space<vmem>>, %arg2: memref<32x32xf32, #tpu.memory_space<vmem>>, %arg3: memref<2x32x128xf32, #tpu.memory_space<vmem>>, %arg4: memref<32x256xf32, #tpu.memory_space<vmem>>, %arg5: memref<5x1x64xf32, #tpu.memory_space<vmem>>, %arg6: memref<2x64x320xbf16, #tpu.memory_space<vmem>>, %arg7: memref<3x64x256xbf16, #tpu.memory_space<vmem>>, %arg8: memref<2x192x64xbf16, #tpu.memory_space<vmem>>, %arg9: memref<1x1xf32, #tpu.memory_space<vmem>>) attributes {dimension_semantics = [#tpu.dimension_semantics<arbitrary>], iteration_bounds = array<i64: 1>, scalar_prefetch = 0 : i64, scratch_operands = 0 : i64, tpu.core_type = #tpu.core_type<tc>, window_params = [{pipeline_mode = #tpu.pipeline_mode<synchronous>, transform_indices = @transform_0, window_bounds = array<i64: 32, 64>}, {pipeline_mode = #tpu.pipeline_mode<synchronous>, transform_indices = @transform_1, window_bounds = array<i64: 32, 32>}, {pipeline_mode = #tpu.pipeline_mode<synchronous>, transform_indices = @transform_2, window_bounds = array<i64: 2, 32, 128>}, {pipeline_mode = #tpu.pipeline_mode<synchronous>, transform_indices = @transform_3, window_bounds = array<i64: 32, 256>}, {pipeline_mode = #tpu.pipeline_mode<synchronous>, transform_indices = @transform_4, window_bounds = array<i64: 5, 1, 64>}, {pipeline_mode = #tpu.pipeline_mode<synchronous>, transform_indices = @transform_5, window_bounds = array<i64: 2, 64, 320>}, {pipeline_mode = #tpu.pipeline_mode<synchronous>, transform_indices = @transform_6, window_bounds = array<i64: 3, 64, 256>}, {pipeline_mode = #tpu.pipeline_mode<synchronous>, transform_indices = @transform_7, window_bounds = array<i64: 2, 192, 64>}, {pipeline_mode = #tpu.pipeline_mode<synchronous>, transform_indices = @transform_8, window_bounds = array<i64: 1, 1>}]} {
    %c0 = arith.constant 0 : index
    %c0_0 = arith.constant 0 : index
    %0 = vector.load %arg1[%c0, %c0_0] : memref<32x64xf32, #tpu.memory_space<vmem>>, vector<32x64xf32>
    %c0_1 = arith.constant 0 : index
    %c0_2 = arith.constant 0 : index
    %c0_3 = arith.constant 0 : index
    %1 = vector.load %arg3[%c0_1, %c0_2, %c0_3] : memref<2x32x128xf32, #tpu.memory_space<vmem>>, vector<1x32x128xf32>
    %2 = vector.shape_cast %1 : vector<1x32x128xf32> to vector<32x128xf32>
    %c1 = arith.constant 1 : index
    %c0_4 = arith.constant 0 : index
    %c0_5 = arith.constant 0 : index
    %3 = vector.load %arg3[%c1, %c0_4, %c0_5] : memref<2x32x128xf32, #tpu.memory_space<vmem>>, vector<1x32x128xf32>
    %4 = vector.shape_cast %3 : vector<1x32x128xf32> to vector<32x128xf32>
    %c0_6 = arith.constant 0 : index
    %c0_7 = arith.constant 0 : index
    %5 = vector.load %arg2[%c0_6, %c0_7] : memref<32x32xf32, #tpu.memory_space<vmem>>, vector<32x32xf32>
    %c0_8 = arith.constant 0 : index
    %c0_9 = arith.constant 0 : index
    %c0_10 = arith.constant 0 : index
    %6 = vector.load %arg5[%c0_8, %c0_9, %c0_10] : memref<5x1x64xf32, #tpu.memory_space<vmem>>, vector<1x1x64xf32>
    %7 = vector.shape_cast %6 : vector<1x1x64xf32> to vector<1x64xf32>
    %8 = arith.mulf %0, %0 : vector<32x64xf32>
    %cst = arith.constant dense<0.000000e+00> : vector<32xf32>
    %9 = vector.multi_reduction <add>, %8, %cst [1] : vector<32x64xf32> to vector<32xf32>
    %10 = vector.shape_cast %9 : vector<32xf32> to vector<32x1xf32>
    %cst_11 = arith.constant 6.400000e+01 : f32
    %11 = vector.broadcast %cst_11 : f32 to vector<32x1xf32>
    %12 = arith.divf %10, %11 : vector<32x1xf32>
    %cst_12 = arith.constant 9.99999997E-7 : f32
    %13 = vector.broadcast %cst_12 : f32 to vector<32x1xf32>
    %14 = arith.addf %12, %13 : vector<32x1xf32>
    %15 = math.rsqrt %14 : vector<32x1xf32>
    %16 = vector.broadcast %15 : vector<32x1xf32> to vector<32x64xf32>
    %17 = arith.mulf %0, %16 : vector<32x64xf32>
    %18 = vector.broadcast %7 : vector<1x64xf32> to vector<32x64xf32>
    %19 = arith.mulf %17, %18 : vector<32x64xf32>
    %20 = arith.truncf %19 : vector<32x64xf32> to vector<32x64xbf16>
    %c0_13 = arith.constant 0 : index
    %c0_14 = arith.constant 0 : index
    %c0_15 = arith.constant 0 : index
    %21 = vector.load %arg6[%c0_13, %c0_14, %c0_15] : memref<2x64x320xbf16, #tpu.memory_space<vmem>>, vector<1x64x320xbf16>
    %22 = vector.shape_cast %21 : vector<1x64x320xbf16> to vector<64x320xbf16>
    %cst_16 = arith.constant dense<0.000000e+00> : vector<32x320xf32>
    %23 = tpu.matmul %20, %22, %cst_16 {dimension_numbers = #tpu.dot_dimension_numbers<[1], [0], [0], [1], [0, 0, 1, 1], [], []>} : vector<32x64xbf16>, vector<64x320xbf16>, vector<32x320xf32> -> vector<32x320xf32>
    %24 = vector.extract_strided_slice %23 {offsets = [0, 0], sizes = [32, 128], strides = [1, 1]} : vector<32x320xf32> to vector<32x128xf32>
    %25 = arith.mulf %24, %2 : vector<32x128xf32>
    %26 = vector.extract_strided_slice %23 {offsets = [0, 128], sizes = [32, 128], strides = [1, 1]} : vector<32x320xf32> to vector<32x128xf32>
    %27 = arith.mulf %26, %4 : vector<32x128xf32>
    %28 = arith.addf %25, %27 : vector<32x128xf32>
    %29 = arith.truncf %28 : vector<32x128xf32> to vector<32x128xbf16>
    %30 = vector.extract_strided_slice %23 {offsets = [0, 256], sizes = [32, 64], strides = [1, 1]} : vector<32x320xf32> to vector<32x64xf32>
    %31 = arith.truncf %30 : vector<32x64xf32> to vector<32x64xbf16>
    %32 = vector.extract_strided_slice %29 {offsets = [0, 0], sizes = [32, 32], strides = [1, 1]} : vector<32x128xbf16> to vector<32x32xbf16>
    %33 = vector.extract_strided_slice %29 {offsets = [0, 64], sizes = [32, 32], strides = [1, 1]} : vector<32x128xbf16> to vector<32x32xbf16>
    %34 = vector.extract_strided_slice %31 {offsets = [0, 0], sizes = [32, 32], strides = [1, 1]} : vector<32x64xbf16> to vector<32x32xbf16>
    %cst_17 = arith.constant dense<0.000000e+00> : vector<32x32xf32>
    %35 = tpu.matmul %32, %33, %cst_17 {dimension_numbers = #tpu.dot_dimension_numbers<[1], [1], [0], [0], [0, 0, 1, 0], [], []>} : vector<32x32xbf16>, vector<32x32xbf16>, vector<32x32xf32> -> vector<32x32xf32>
    %cst_18 = arith.constant 0.176776692 : f32
    %36 = vector.broadcast %cst_18 : f32 to vector<32x32xf32>
    %37 = arith.mulf %35, %36 : vector<32x32xf32>
    %38 = arith.addf %37, %5 : vector<32x32xf32>
    %cst_19 = arith.constant dense<0xFF800000> : vector<32xf32>
    %39 = vector.multi_reduction <maximumf>, %38, %cst_19 [1] : vector<32x32xf32> to vector<32xf32>
    %40 = vector.shape_cast %39 : vector<32xf32> to vector<32x1xf32>
    %41 = vector.broadcast %40 : vector<32x1xf32> to vector<32x32xf32>
    %42 = arith.subf %38, %41 : vector<32x32xf32>
    %43 = math.exp %42 : vector<32x32xf32>
    %cst_20 = arith.constant dense<0.000000e+00> : vector<32xf32>
    %44 = vector.multi_reduction <add>, %43, %cst_20 [1] : vector<32x32xf32> to vector<32xf32>
    %45 = vector.shape_cast %44 : vector<32xf32> to vector<32x1xf32>
    %46 = tpu.reciprocal %45 {approx = true} : vector<32x1xf32> -> vector<32x1xf32>
    %47 = vector.broadcast %46 : vector<32x1xf32> to vector<32x32xf32>
    %48 = arith.mulf %43, %47 : vector<32x32xf32>
    %49 = arith.truncf %48 : vector<32x32xf32> to vector<32x32xbf16>
    %cst_21 = arith.constant dense<0.000000e+00> : vector<32x32xf32>
    %50 = tpu.matmul %49, %34, %cst_21 {dimension_numbers = #tpu.dot_dimension_numbers<[1], [0], [0], [1], [0, 0, 1, 1], [], []>} : vector<32x32xbf16>, vector<32x32xbf16>, vector<32x32xf32> -> vector<32x32xf32>
    %51 = arith.truncf %50 : vector<32x32xf32> to vector<32x32xbf16>
    %c0_22 = arith.constant 0 : index
    %c0_23 = arith.constant 0 : index
    %c0_24 = arith.constant 0 : index
    %52 = vector.load %arg8[%c0_22, %c0_23, %c0_24] : memref<2x192x64xbf16, #tpu.memory_space<vmem>>, vector<1x32x64xbf16>
    %53 = vector.shape_cast %52 : vector<1x32x64xbf16> to vector<32x64xbf16>
    %cst_25 = arith.constant dense<0.000000e+00> : vector<32x64xf32>
    %54 = tpu.matmul %51, %53, %cst_25 {dimension_numbers = #tpu.dot_dimension_numbers<[1], [0], [0], [1], [0, 0, 1, 1], [], []>} : vector<32x32xbf16>, vector<32x64xbf16>, vector<32x64xf32> -> vector<32x64xf32>
    %55 = vector.extract_strided_slice %29 {offsets = [0, 32], sizes = [32, 32], strides = [1, 1]} : vector<32x128xbf16> to vector<32x32xbf16>
    %56 = vector.extract_strided_slice %29 {offsets = [0, 96], sizes = [32, 32], strides = [1, 1]} : vector<32x128xbf16> to vector<32x32xbf16>
    %57 = vector.extract_strided_slice %31 {offsets = [0, 32], sizes = [32, 32], strides = [1, 1]} : vector<32x64xbf16> to vector<32x32xbf16>
    %cst_26 = arith.constant dense<0.000000e+00> : vector<32x32xf32>
    %58 = tpu.matmul %55, %56, %cst_26 {dimension_numbers = #tpu.dot_dimension_numbers<[1], [1], [0], [0], [0, 0, 1, 0], [], []>} : vector<32x32xbf16>, vector<32x32xbf16>, vector<32x32xf32> -> vector<32x32xf32>
    %cst_27 = arith.constant 0.176776692 : f32
    %59 = vector.broadcast %cst_27 : f32 to vector<32x32xf32>
    %60 = arith.mulf %58, %59 : vector<32x32xf32>
    %61 = arith.addf %60, %5 : vector<32x32xf32>
    %cst_28 = arith.constant dense<0xFF800000> : vector<32xf32>
    %62 = vector.multi_reduction <maximumf>, %61, %cst_28 [1] : vector<32x32xf32> to vector<32xf32>
    %63 = vector.shape_cast %62 : vector<32xf32> to vector<32x1xf32>
    %64 = vector.broadcast %63 : vector<32x1xf32> to vector<32x32xf32>
    %65 = arith.subf %61, %64 : vector<32x32xf32>
    %66 = math.exp %65 : vector<32x32xf32>
    %cst_29 = arith.constant dense<0.000000e+00> : vector<32xf32>
    %67 = vector.multi_reduction <add>, %66, %cst_29 [1] : vector<32x32xf32> to vector<32xf32>
    %68 = vector.shape_cast %67 : vector<32xf32> to vector<32x1xf32>
    %69 = tpu.reciprocal %68 {approx = true} : vector<32x1xf32> -> vector<32x1xf32>
    %70 = vector.broadcast %69 : vector<32x1xf32> to vector<32x32xf32>
    %71 = arith.mulf %66, %70 : vector<32x32xf32>
    %72 = arith.truncf %71 : vector<32x32xf32> to vector<32x32xbf16>
    %cst_30 = arith.constant dense<0.000000e+00> : vector<32x32xf32>
    %73 = tpu.matmul %72, %57, %cst_30 {dimension_numbers = #tpu.dot_dimension_numbers<[1], [0], [0], [1], [0, 0, 1, 1], [], []>} : vector<32x32xbf16>, vector<32x32xbf16>, vector<32x32xf32> -> vector<32x32xf32>
    %74 = arith.truncf %73 : vector<32x32xf32> to vector<32x32xbf16>
    %c0_31 = arith.constant 0 : index
    %c32 = arith.constant 32 : index
    %c0_32 = arith.constant 0 : index
    %75 = vector.load %arg8[%c0_31, %c32, %c0_32] : memref<2x192x64xbf16, #tpu.memory_space<vmem>>, vector<1x32x64xbf16>
    %76 = vector.shape_cast %75 : vector<1x32x64xbf16> to vector<32x64xbf16>
    %cst_33 = arith.constant dense<0.000000e+00> : vector<32x64xf32>
    %77 = tpu.matmul %74, %76, %cst_33 {dimension_numbers = #tpu.dot_dimension_numbers<[1], [0], [0], [1], [0, 0, 1, 1], [], []>} : vector<32x32xbf16>, vector<32x64xbf16>, vector<32x64xf32> -> vector<32x64xf32>
    %78 = arith.addf %54, %77 : vector<32x64xf32>
    %79 = arith.addf %0, %78 : vector<32x64xf32>
    %c1_34 = arith.constant 1 : index
    %c0_35 = arith.constant 0 : index
    %c0_36 = arith.constant 0 : index
    %80 = vector.load %arg5[%c1_34, %c0_35, %c0_36] : memref<5x1x64xf32, #tpu.memory_space<vmem>>, vector<1x1x64xf32>
    %81 = vector.shape_cast %80 : vector<1x1x64xf32> to vector<1x64xf32>
    %82 = arith.mulf %79, %79 : vector<32x64xf32>
    %cst_37 = arith.constant dense<0.000000e+00> : vector<32xf32>
    %83 = vector.multi_reduction <add>, %82, %cst_37 [1] : vector<32x64xf32> to vector<32xf32>
    %84 = vector.shape_cast %83 : vector<32xf32> to vector<32x1xf32>
    %cst_38 = arith.constant 6.400000e+01 : f32
    %85 = vector.broadcast %cst_38 : f32 to vector<32x1xf32>
    %86 = arith.divf %84, %85 : vector<32x1xf32>
    %cst_39 = arith.constant 9.99999997E-7 : f32
    %87 = vector.broadcast %cst_39 : f32 to vector<32x1xf32>
    %88 = arith.addf %86, %87 : vector<32x1xf32>
    %89 = math.rsqrt %88 : vector<32x1xf32>
    %90 = vector.broadcast %89 : vector<32x1xf32> to vector<32x64xf32>
    %91 = arith.mulf %79, %90 : vector<32x64xf32>
    %92 = vector.broadcast %81 : vector<1x64xf32> to vector<32x64xf32>
    %93 = arith.mulf %91, %92 : vector<32x64xf32>
    %94 = arith.truncf %93 : vector<32x64xf32> to vector<32x64xbf16>
    %c0_40 = arith.constant 0 : index
    %c0_41 = arith.constant 0 : index
    %c0_42 = arith.constant 0 : index
    %95 = vector.load %arg7[%c0_40, %c0_41, %c0_42] : memref<3x64x256xbf16, #tpu.memory_space<vmem>>, vector<1x64x256xbf16>
    %96 = vector.shape_cast %95 : vector<1x64x256xbf16> to vector<64x256xbf16>
    %cst_43 = arith.constant dense<0.000000e+00> : vector<32x256xf32>
    %97 = tpu.matmul %94, %96, %cst_43 {dimension_numbers = #tpu.dot_dimension_numbers<[1], [0], [0], [1], [0, 0, 1, 1], [], []>} : vector<32x64xbf16>, vector<64x256xbf16>, vector<32x256xf32> -> vector<32x256xf32>
    %98 = vector.extract_strided_slice %97 {offsets = [0, 0], sizes = [32, 128], strides = [1, 1]} : vector<32x256xf32> to vector<32x128xf32>
    %99 = vector.extract_strided_slice %97 {offsets = [0, 128], sizes = [32, 128], strides = [1, 1]} : vector<32x256xf32> to vector<32x128xf32>
    %100 = arith.negf %98 : vector<32x128xf32>
    %101 = math.exp %100 : vector<32x128xf32>
    %cst_44 = arith.constant 1.000000e+00 : f32
    %102 = vector.broadcast %cst_44 : f32 to vector<32x128xf32>
    %103 = arith.addf %102, %101 : vector<32x128xf32>
    %104 = arith.divf %102, %103 : vector<32x128xf32>
    %105 = arith.mulf %98, %104 : vector<32x128xf32>
    %106 = arith.mulf %105, %99 : vector<32x128xf32>
    %107 = arith.truncf %106 : vector<32x128xf32> to vector<32x128xbf16>
    %c0_45 = arith.constant 0 : index
    %c64 = arith.constant 64 : index
    %c0_46 = arith.constant 0 : index
    %108 = vector.load %arg8[%c0_45, %c64, %c0_46] : memref<2x192x64xbf16, #tpu.memory_space<vmem>>, vector<1x128x64xbf16>
    %109 = vector.shape_cast %108 : vector<1x128x64xbf16> to vector<128x64xbf16>
    %cst_47 = arith.constant dense<0.000000e+00> : vector<32x64xf32>
    %110 = tpu.matmul %107, %109, %cst_47 {dimension_numbers = #tpu.dot_dimension_numbers<[1], [0], [0], [1], [0, 0, 1, 1], [], []>} : vector<32x128xbf16>, vector<128x64xbf16>, vector<32x64xf32> -> vector<32x64xf32>
    %111 = arith.addf %79, %110 : vector<32x64xf32>
    %c2 = arith.constant 2 : index
    %c0_48 = arith.constant 0 : index
    %c0_49 = arith.constant 0 : index
    %112 = vector.load %arg5[%c2, %c0_48, %c0_49] : memref<5x1x64xf32, #tpu.memory_space<vmem>>, vector<1x1x64xf32>
    %113 = vector.shape_cast %112 : vector<1x1x64xf32> to vector<1x64xf32>
    %114 = arith.mulf %111, %111 : vector<32x64xf32>
    %cst_50 = arith.constant dense<0.000000e+00> : vector<32xf32>
    %115 = vector.multi_reduction <add>, %114, %cst_50 [1] : vector<32x64xf32> to vector<32xf32>
    %116 = vector.shape_cast %115 : vector<32xf32> to vector<32x1xf32>
    %cst_51 = arith.constant 6.400000e+01 : f32
    %117 = vector.broadcast %cst_51 : f32 to vector<32x1xf32>
    %118 = arith.divf %116, %117 : vector<32x1xf32>
    %cst_52 = arith.constant 9.99999997E-7 : f32
    %119 = vector.broadcast %cst_52 : f32 to vector<32x1xf32>
    %120 = arith.addf %118, %119 : vector<32x1xf32>
    %121 = math.rsqrt %120 : vector<32x1xf32>
    %122 = vector.broadcast %121 : vector<32x1xf32> to vector<32x64xf32>
    %123 = arith.mulf %111, %122 : vector<32x64xf32>
    %124 = vector.broadcast %113 : vector<1x64xf32> to vector<32x64xf32>
    %125 = arith.mulf %123, %124 : vector<32x64xf32>
    %126 = arith.truncf %125 : vector<32x64xf32> to vector<32x64xbf16>
    %c1_53 = arith.constant 1 : index
    %c0_54 = arith.constant 0 : index
    %c0_55 = arith.constant 0 : index
    %127 = vector.load %arg6[%c1_53, %c0_54, %c0_55] : memref<2x64x320xbf16, #tpu.memory_space<vmem>>, vector<1x64x320xbf16>
    %128 = vector.shape_cast %127 : vector<1x64x320xbf16> to vector<64x320xbf16>
    %cst_56 = arith.constant dense<0.000000e+00> : vector<32x320xf32>
    %129 = tpu.matmul %126, %128, %cst_56 {dimension_numbers = #tpu.dot_dimension_numbers<[1], [0], [0], [1], [0, 0, 1, 1], [], []>} : vector<32x64xbf16>, vector<64x320xbf16>, vector<32x320xf32> -> vector<32x320xf32>
    %130 = vector.extract_strided_slice %129 {offsets = [0, 0], sizes = [32, 128], strides = [1, 1]} : vector<32x320xf32> to vector<32x128xf32>
    %131 = arith.mulf %130, %2 : vector<32x128xf32>
    %132 = vector.extract_strided_slice %129 {offsets = [0, 128], sizes = [32, 128], strides = [1, 1]} : vector<32x320xf32> to vector<32x128xf32>
    %133 = arith.mulf %132, %4 : vector<32x128xf32>
    %134 = arith.addf %131, %133 : vector<32x128xf32>
    %135 = arith.truncf %134 : vector<32x128xf32> to vector<32x128xbf16>
    %136 = vector.extract_strided_slice %129 {offsets = [0, 256], sizes = [32, 64], strides = [1, 1]} : vector<32x320xf32> to vector<32x64xf32>
    %137 = arith.truncf %136 : vector<32x64xf32> to vector<32x64xbf16>
    %138 = vector.extract_strided_slice %135 {offsets = [0, 0], sizes = [32, 32], strides = [1, 1]} : vector<32x128xbf16> to vector<32x32xbf16>
    %139 = vector.extract_strided_slice %135 {offsets = [0, 64], sizes = [32, 32], strides = [1, 1]} : vector<32x128xbf16> to vector<32x32xbf16>
    %140 = vector.extract_strided_slice %137 {offsets = [0, 0], sizes = [32, 32], strides = [1, 1]} : vector<32x64xbf16> to vector<32x32xbf16>
    %cst_57 = arith.constant dense<0.000000e+00> : vector<32x32xf32>
    %141 = tpu.matmul %138, %139, %cst_57 {dimension_numbers = #tpu.dot_dimension_numbers<[1], [1], [0], [0], [0, 0, 1, 0], [], []>} : vector<32x32xbf16>, vector<32x32xbf16>, vector<32x32xf32> -> vector<32x32xf32>
    %cst_58 = arith.constant 0.176776692 : f32
    %142 = vector.broadcast %cst_58 : f32 to vector<32x32xf32>
    %143 = arith.mulf %141, %142 : vector<32x32xf32>
    %144 = arith.addf %143, %5 : vector<32x32xf32>
    %cst_59 = arith.constant dense<0xFF800000> : vector<32xf32>
    %145 = vector.multi_reduction <maximumf>, %144, %cst_59 [1] : vector<32x32xf32> to vector<32xf32>
    %146 = vector.shape_cast %145 : vector<32xf32> to vector<32x1xf32>
    %147 = vector.broadcast %146 : vector<32x1xf32> to vector<32x32xf32>
    %148 = arith.subf %144, %147 : vector<32x32xf32>
    %149 = math.exp %148 : vector<32x32xf32>
    %cst_60 = arith.constant dense<0.000000e+00> : vector<32xf32>
    %150 = vector.multi_reduction <add>, %149, %cst_60 [1] : vector<32x32xf32> to vector<32xf32>
    %151 = vector.shape_cast %150 : vector<32xf32> to vector<32x1xf32>
    %152 = tpu.reciprocal %151 {approx = true} : vector<32x1xf32> -> vector<32x1xf32>
    %153 = vector.broadcast %152 : vector<32x1xf32> to vector<32x32xf32>
    %154 = arith.mulf %149, %153 : vector<32x32xf32>
    %155 = arith.truncf %154 : vector<32x32xf32> to vector<32x32xbf16>
    %cst_61 = arith.constant dense<0.000000e+00> : vector<32x32xf32>
    %156 = tpu.matmul %155, %140, %cst_61 {dimension_numbers = #tpu.dot_dimension_numbers<[1], [0], [0], [1], [0, 0, 1, 1], [], []>} : vector<32x32xbf16>, vector<32x32xbf16>, vector<32x32xf32> -> vector<32x32xf32>
    %157 = arith.truncf %156 : vector<32x32xf32> to vector<32x32xbf16>
    %c1_62 = arith.constant 1 : index
    %c0_63 = arith.constant 0 : index
    %c0_64 = arith.constant 0 : index
    %158 = vector.load %arg8[%c1_62, %c0_63, %c0_64] : memref<2x192x64xbf16, #tpu.memory_space<vmem>>, vector<1x32x64xbf16>
    %159 = vector.shape_cast %158 : vector<1x32x64xbf16> to vector<32x64xbf16>
    %cst_65 = arith.constant dense<0.000000e+00> : vector<32x64xf32>
    %160 = tpu.matmul %157, %159, %cst_65 {dimension_numbers = #tpu.dot_dimension_numbers<[1], [0], [0], [1], [0, 0, 1, 1], [], []>} : vector<32x32xbf16>, vector<32x64xbf16>, vector<32x64xf32> -> vector<32x64xf32>
    %161 = vector.extract_strided_slice %135 {offsets = [0, 32], sizes = [32, 32], strides = [1, 1]} : vector<32x128xbf16> to vector<32x32xbf16>
    %162 = vector.extract_strided_slice %135 {offsets = [0, 96], sizes = [32, 32], strides = [1, 1]} : vector<32x128xbf16> to vector<32x32xbf16>
    %163 = vector.extract_strided_slice %137 {offsets = [0, 32], sizes = [32, 32], strides = [1, 1]} : vector<32x64xbf16> to vector<32x32xbf16>
    %cst_66 = arith.constant dense<0.000000e+00> : vector<32x32xf32>
    %164 = tpu.matmul %161, %162, %cst_66 {dimension_numbers = #tpu.dot_dimension_numbers<[1], [1], [0], [0], [0, 0, 1, 0], [], []>} : vector<32x32xbf16>, vector<32x32xbf16>, vector<32x32xf32> -> vector<32x32xf32>
    %cst_67 = arith.constant 0.176776692 : f32
    %165 = vector.broadcast %cst_67 : f32 to vector<32x32xf32>
    %166 = arith.mulf %164, %165 : vector<32x32xf32>
    %167 = arith.addf %166, %5 : vector<32x32xf32>
    %cst_68 = arith.constant dense<0xFF800000> : vector<32xf32>
    %168 = vector.multi_reduction <maximumf>, %167, %cst_68 [1] : vector<32x32xf32> to vector<32xf32>
    %169 = vector.shape_cast %168 : vector<32xf32> to vector<32x1xf32>
    %170 = vector.broadcast %169 : vector<32x1xf32> to vector<32x32xf32>
    %171 = arith.subf %167, %170 : vector<32x32xf32>
    %172 = math.exp %171 : vector<32x32xf32>
    %cst_69 = arith.constant dense<0.000000e+00> : vector<32xf32>
    %173 = vector.multi_reduction <add>, %172, %cst_69 [1] : vector<32x32xf32> to vector<32xf32>
    %174 = vector.shape_cast %173 : vector<32xf32> to vector<32x1xf32>
    %175 = tpu.reciprocal %174 {approx = true} : vector<32x1xf32> -> vector<32x1xf32>
    %176 = vector.broadcast %175 : vector<32x1xf32> to vector<32x32xf32>
    %177 = arith.mulf %172, %176 : vector<32x32xf32>
    %178 = arith.truncf %177 : vector<32x32xf32> to vector<32x32xbf16>
    %cst_70 = arith.constant dense<0.000000e+00> : vector<32x32xf32>
    %179 = tpu.matmul %178, %163, %cst_70 {dimension_numbers = #tpu.dot_dimension_numbers<[1], [0], [0], [1], [0, 0, 1, 1], [], []>} : vector<32x32xbf16>, vector<32x32xbf16>, vector<32x32xf32> -> vector<32x32xf32>
    %180 = arith.truncf %179 : vector<32x32xf32> to vector<32x32xbf16>
    %c1_71 = arith.constant 1 : index
    %c32_72 = arith.constant 32 : index
    %c0_73 = arith.constant 0 : index
    %181 = vector.load %arg8[%c1_71, %c32_72, %c0_73] : memref<2x192x64xbf16, #tpu.memory_space<vmem>>, vector<1x32x64xbf16>
    %182 = vector.shape_cast %181 : vector<1x32x64xbf16> to vector<32x64xbf16>
    %cst_74 = arith.constant dense<0.000000e+00> : vector<32x64xf32>
    %183 = tpu.matmul %180, %182, %cst_74 {dimension_numbers = #tpu.dot_dimension_numbers<[1], [0], [0], [1], [0, 0, 1, 1], [], []>} : vector<32x32xbf16>, vector<32x64xbf16>, vector<32x64xf32> -> vector<32x64xf32>
    %184 = arith.addf %160, %183 : vector<32x64xf32>
    %185 = arith.addf %111, %184 : vector<32x64xf32>
    %c3 = arith.constant 3 : index
    %c0_75 = arith.constant 0 : index
    %c0_76 = arith.constant 0 : index
    %186 = vector.load %arg5[%c3, %c0_75, %c0_76] : memref<5x1x64xf32, #tpu.memory_space<vmem>>, vector<1x1x64xf32>
    %187 = vector.shape_cast %186 : vector<1x1x64xf32> to vector<1x64xf32>
    %188 = arith.mulf %185, %185 : vector<32x64xf32>
    %cst_77 = arith.constant dense<0.000000e+00> : vector<32xf32>
    %189 = vector.multi_reduction <add>, %188, %cst_77 [1] : vector<32x64xf32> to vector<32xf32>
    %190 = vector.shape_cast %189 : vector<32xf32> to vector<32x1xf32>
    %cst_78 = arith.constant 6.400000e+01 : f32
    %191 = vector.broadcast %cst_78 : f32 to vector<32x1xf32>
    %192 = arith.divf %190, %191 : vector<32x1xf32>
    %cst_79 = arith.constant 9.99999997E-7 : f32
    %193 = vector.broadcast %cst_79 : f32 to vector<32x1xf32>
    %194 = arith.addf %192, %193 : vector<32x1xf32>
    %195 = math.rsqrt %194 : vector<32x1xf32>
    %196 = vector.broadcast %195 : vector<32x1xf32> to vector<32x64xf32>
    %197 = arith.mulf %185, %196 : vector<32x64xf32>
    %198 = vector.broadcast %187 : vector<1x64xf32> to vector<32x64xf32>
    %199 = arith.mulf %197, %198 : vector<32x64xf32>
    %200 = arith.truncf %199 : vector<32x64xf32> to vector<32x64xbf16>
    %c1_80 = arith.constant 1 : index
    %c0_81 = arith.constant 0 : index
    %c0_82 = arith.constant 0 : index
    %201 = vector.load %arg7[%c1_80, %c0_81, %c0_82] : memref<3x64x256xbf16, #tpu.memory_space<vmem>>, vector<1x64x256xbf16>
    %202 = vector.shape_cast %201 : vector<1x64x256xbf16> to vector<64x256xbf16>
    %cst_83 = arith.constant dense<0.000000e+00> : vector<32x256xf32>
    %203 = tpu.matmul %200, %202, %cst_83 {dimension_numbers = #tpu.dot_dimension_numbers<[1], [0], [0], [1], [0, 0, 1, 1], [], []>} : vector<32x64xbf16>, vector<64x256xbf16>, vector<32x256xf32> -> vector<32x256xf32>
    %204 = vector.extract_strided_slice %203 {offsets = [0, 0], sizes = [32, 128], strides = [1, 1]} : vector<32x256xf32> to vector<32x128xf32>
    %205 = vector.extract_strided_slice %203 {offsets = [0, 128], sizes = [32, 128], strides = [1, 1]} : vector<32x256xf32> to vector<32x128xf32>
    %206 = arith.negf %204 : vector<32x128xf32>
    %207 = math.exp %206 : vector<32x128xf32>
    %cst_84 = arith.constant 1.000000e+00 : f32
    %208 = vector.broadcast %cst_84 : f32 to vector<32x128xf32>
    %209 = arith.addf %208, %207 : vector<32x128xf32>
    %210 = arith.divf %208, %209 : vector<32x128xf32>
    %211 = arith.mulf %204, %210 : vector<32x128xf32>
    %212 = arith.mulf %211, %205 : vector<32x128xf32>
    %213 = arith.truncf %212 : vector<32x128xf32> to vector<32x128xbf16>
    %c1_85 = arith.constant 1 : index
    %c64_86 = arith.constant 64 : index
    %c0_87 = arith.constant 0 : index
    %214 = vector.load %arg8[%c1_85, %c64_86, %c0_87] : memref<2x192x64xbf16, #tpu.memory_space<vmem>>, vector<1x128x64xbf16>
    %215 = vector.shape_cast %214 : vector<1x128x64xbf16> to vector<128x64xbf16>
    %cst_88 = arith.constant dense<0.000000e+00> : vector<32x64xf32>
    %216 = tpu.matmul %213, %215, %cst_88 {dimension_numbers = #tpu.dot_dimension_numbers<[1], [0], [0], [1], [0, 0, 1, 1], [], []>} : vector<32x128xbf16>, vector<128x64xbf16>, vector<32x64xf32> -> vector<32x64xf32>
    %217 = arith.addf %185, %216 : vector<32x64xf32>
    %c4 = arith.constant 4 : index
    %c0_89 = arith.constant 0 : index
    %c0_90 = arith.constant 0 : index
    %218 = vector.load %arg5[%c4, %c0_89, %c0_90] : memref<5x1x64xf32, #tpu.memory_space<vmem>>, vector<1x1x64xf32>
    %219 = vector.shape_cast %218 : vector<1x1x64xf32> to vector<1x64xf32>
    %220 = arith.mulf %217, %217 : vector<32x64xf32>
    %cst_91 = arith.constant dense<0.000000e+00> : vector<32xf32>
    %221 = vector.multi_reduction <add>, %220, %cst_91 [1] : vector<32x64xf32> to vector<32xf32>
    %222 = vector.shape_cast %221 : vector<32xf32> to vector<32x1xf32>
    %cst_92 = arith.constant 6.400000e+01 : f32
    %223 = vector.broadcast %cst_92 : f32 to vector<32x1xf32>
    %224 = arith.divf %222, %223 : vector<32x1xf32>
    %cst_93 = arith.constant 9.99999997E-7 : f32
    %225 = vector.broadcast %cst_93 : f32 to vector<32x1xf32>
    %226 = arith.addf %224, %225 : vector<32x1xf32>
    %227 = math.rsqrt %226 : vector<32x1xf32>
    %228 = vector.broadcast %227 : vector<32x1xf32> to vector<32x64xf32>
    %229 = arith.mulf %217, %228 : vector<32x64xf32>
    %230 = vector.broadcast %219 : vector<1x64xf32> to vector<32x64xf32>
    %231 = arith.mulf %229, %230 : vector<32x64xf32>
    %232 = arith.truncf %231 : vector<32x64xf32> to vector<32x64xbf16>
    %c2_94 = arith.constant 2 : index
    %c0_95 = arith.constant 0 : index
    %c0_96 = arith.constant 0 : index
    %233 = vector.load %arg7[%c2_94, %c0_95, %c0_96] : memref<3x64x256xbf16, #tpu.memory_space<vmem>>, vector<1x64x256xbf16>
    %234 = vector.shape_cast %233 : vector<1x64x256xbf16> to vector<64x256xbf16>
    %cst_97 = arith.constant dense<0.000000e+00> : vector<32x256xf32>
    %235 = tpu.matmul %232, %234, %cst_97 {dimension_numbers = #tpu.dot_dimension_numbers<[1], [0], [0], [1], [0, 0, 1, 1], [], []>} : vector<32x64xbf16>, vector<64x256xbf16>, vector<32x256xf32> -> vector<32x256xf32>
    %cst_98 = arith.constant dense<0xFF800000> : vector<32xf32>
    %236 = vector.multi_reduction <maximumf>, %235, %cst_98 [1] : vector<32x256xf32> to vector<32xf32>
    %237 = vector.shape_cast %236 : vector<32xf32> to vector<32x1xf32>
    %238 = vector.broadcast %237 : vector<32x1xf32> to vector<32x256xf32>
    %239 = arith.subf %235, %238 : vector<32x256xf32>
    %240 = math.exp %239 : vector<32x256xf32>
    %cst_99 = arith.constant dense<0.000000e+00> : vector<32xf32>
    %241 = vector.multi_reduction <add>, %240, %cst_99 [1] : vector<32x256xf32> to vector<32xf32>
    %242 = vector.shape_cast %241 : vector<32xf32> to vector<32x1xf32>
    %243 = math.log %242 : vector<32x1xf32>
    %244 = arith.addf %243, %237 : vector<32x1xf32>
    %c0_100 = arith.constant 0 : index
    %c0_101 = arith.constant 0 : index
    %245 = vector.load %arg4[%c0_100, %c0_101] : memref<32x256xf32, #tpu.memory_space<vmem>>, vector<32x256xf32>
    %246 = arith.mulf %235, %245 : vector<32x256xf32>
    %cst_102 = arith.constant dense<0.000000e+00> : vector<32xf32>
    %247 = vector.multi_reduction <add>, %246, %cst_102 [1] : vector<32x256xf32> to vector<32xf32>
    %248 = vector.shape_cast %247 : vector<32xf32> to vector<32x1xf32>
    %cst_103 = arith.constant dense<0.000000e+00> : vector<32xf32>
    %249 = vector.multi_reduction <add>, %245, %cst_103 [1] : vector<32x256xf32> to vector<32xf32>
    %250 = vector.shape_cast %249 : vector<32xf32> to vector<32x1xf32>
    %251 = arith.mulf %244, %250 : vector<32x1xf32>
    %252 = arith.subf %251, %248 : vector<32x1xf32>
    %253 = vector.shape_cast %252 : vector<32x1xf32> to vector<1x32x1xf32>
    %cst_104 = arith.constant dense<0.000000e+00> : vector<1xf32>
    %254 = vector.multi_reduction <add>, %253, %cst_104 [1, 2] : vector<1x32x1xf32> to vector<1xf32>
    %255 = vector.shape_cast %254 : vector<1xf32> to vector<1x1x1xf32>
    %256 = vector.extract %255[0, 0, 0] : f32 from vector<1x1x1xf32>
    %257 = vector.broadcast %256 : f32 to vector<1x1xf32>
    %c0_105 = arith.constant 0 : index
    %c0_106 = arith.constant 0 : index
    %258 = vector.load %arg9[%c0_105, %c0_106] : memref<1x1xf32, #tpu.memory_space<vmem>>, vector<1x1xf32>
    tpu.vector_store %arg9[%c0_105, %c0_106], %257 {strides = array<i32>} : memref<1x1xf32, #tpu.memory_space<vmem>>, vector<1x1xf32>,
    return
  }
  func.func @transform_0(%arg0: i32) -> (i32, i32) {
    %c0_i32 = arith.constant 0 : i32
    %c0_i32_0 = arith.constant 0 : i32
    %c0_i32_1 = arith.constant 0 : i32
    return %c0_i32, %c0_i32_0 : i32, i32
  }
  func.func @transform_1(%arg0: i32) -> (i32, i32) {
    %c0_i32 = arith.constant 0 : i32
    %c0_i32_0 = arith.constant 0 : i32
    %c0_i32_1 = arith.constant 0 : i32
    return %c0_i32, %c0_i32_0 : i32, i32
  }
  func.func @transform_2(%arg0: i32) -> (i32, i32, i32) {
    %c0_i32 = arith.constant 0 : i32
    %c0_i32_0 = arith.constant 0 : i32
    %c0_i32_1 = arith.constant 0 : i32
    %c0_i32_2 = arith.constant 0 : i32
    return %c0_i32, %c0_i32_0, %c0_i32_1 : i32, i32, i32
  }
  func.func @transform_3(%arg0: i32) -> (i32, i32) {
    %c0_i32 = arith.constant 0 : i32
    %c0_i32_0 = arith.constant 0 : i32
    %c0_i32_1 = arith.constant 0 : i32
    return %c0_i32, %c0_i32_0 : i32, i32
  }
  func.func @transform_4(%arg0: i32) -> (i32, i32, i32) {
    %c0_i32 = arith.constant 0 : i32
    %c0_i32_0 = arith.constant 0 : i32
    %c0_i32_1 = arith.constant 0 : i32
    %c0_i32_2 = arith.constant 0 : i32
    return %c0_i32, %c0_i32_0, %c0_i32_1 : i32, i32, i32
  }
  func.func @transform_5(%arg0: i32) -> (i32, i32, i32) {
    %c0_i32 = arith.constant 0 : i32
    %c0_i32_0 = arith.constant 0 : i32
    %c0_i32_1 = arith.constant 0 : i32
    %c0_i32_2 = arith.constant 0 : i32
    return %c0_i32, %c0_i32_0, %c0_i32_1 : i32, i32, i32
  }
  func.func @transform_6(%arg0: i32) -> (i32, i32, i32) {
    %c0_i32 = arith.constant 0 : i32
    %c0_i32_0 = arith.constant 0 : i32
    %c0_i32_1 = arith.constant 0 : i32
    %c0_i32_2 = arith.constant 0 : i32
    return %c0_i32, %c0_i32_0, %c0_i32_1 : i32, i32, i32
  }
  func.func @transform_7(%arg0: i32) -> (i32, i32, i32) {
    %c0_i32 = arith.constant 0 : i32
    %c0_i32_0 = arith.constant 0 : i32
    %c0_i32_1 = arith.constant 0 : i32
    %c0_i32_2 = arith.constant 0 : i32
    return %c0_i32, %c0_i32_0, %c0_i32_1 : i32, i32, i32
  }
  func.func @transform_8(%arg0: i32) -> (i32, i32) {
    %c0_i32 = arith.constant 0 : i32
    %c0_i32_0 = arith.constant 0 : i32
    %c0_i32_1 = arith.constant 0 : i32
    return %c0_i32, %c0_i32_0 : i32, i32
  }
}

</mosaic_0001>

<bundles_post_ra>
// kernel: tpu_custom_call.1
= control target key start
LH: loop header
LB: loop body
LE: loop exit
PB: predicated region body
PF: predicated region fallthrough
CT: control target
= control target key end

     0   :  { %13 = vsyncpa [#allocation3], 0  ;;  %s3938_s0 = inlined_call_operand.hbm [shape: f32[32,64], index: 0, kind: input, shape index: {}]   ;;  %s3939_s1 = inlined_call_operand.hbm [shape: f32[32,32], index: 1, kind: input, shape index: {}]   ;;  %s3940_s2 = inlined_call_operand.vmem [shape: f32[2,32,128], index: 2, kind: input, shape index: {}]   ;;  %s3941_s3 = inlined_call_operand.vmem [shape: f32[32,256], index: 3, kind: input, shape index: {}]   ;;  %s3942_s4 = inlined_call_operand.vmem [shape: f32[5,1,64], index: 4, kind: input, shape index: {}]   ;;  %s3943_s5 = inlined_call_operand.vmem [shape: bf16[2,64,320], index: 5, kind: input, shape index: {}]   ;;  %s3944_s6 = inlined_call_operand.hbm [shape: bf16[3,64,256], index: 6, kind: input, shape index: {}]   ;;  %s3945_s7 = inlined_call_operand.vmem [shape: bf16[2,192,64], index: 7, kind: input, shape index: {}]   ;;  %s3946_s8 = inlined_call_operand.hbm [shape: f32[1,1], index: 8, kind: output, shape index: {}]  }
   0x1   :  { %14 = vsyncpa [#allocation6], 0 }
   0x2   :  { %15 = vsyncpa [#allocation4], 0  ;;  %s3294_s27 = smov [#allocation5]   ;;  %s3295_s29 = smov [#allocation2]  }
   0x3   :  { %s33_s28 = sshll.u32 %s3294_s27, 4  ;;  %s21_s30 = sshll.u32 %s3295_s29, 4  ;;  %s34_s28 = int_to_ptr.vmem [resolvable:$true] %s33_s28  ;;  %s22_s30 = int_to_ptr.vmem [resolvable:$true] %s21_s30 }
   0x4   :  { %s3216_s9 = scalar_lea.vmem %s34_s28, 512  ;;  %p3221_p1 = scmp.lt.s32.totalorder %s34_s28, %s34_s28 }
   0x5   :  { %p3217_p0 = scmp.ne.s32.totalorder %s34_s28, %s3216_s9  ;;  %p3222_p2 = scmp.lt.s32.totalorder %s3216_s9, %s3216_s9 }
   0x7   :  { %p3223_p3 = por %p3222_p2, %p3221_p1 }
   0x9   :  { %p3224_p4 = pnand %p3223_p3, %p3217_p0 }
   0xb   :  { %3227 = shalt.err (!%p3224_p4)
}
   0xc   :  { %s3296_s10 = smov 128   ;;  %s3297_s11 = smov 8  }
   0xd   :  { %39 = dma.hbm_to_vmem [thread:$0]  %s3939_s1, 512, %s34_s28, [#allocation6], %s3296_s10, %s3296_s10, %s3297_s11  }
   0xe   :  { %s3236_s14 = scalar_lea.vmem %s22_s30, 512  ;;  %p3241_p6 = scmp.lt.s32.totalorder %s22_s30, %s22_s30 }
   0xf   :  { %p3237_p5 = scmp.ne.s32.totalorder %s22_s30, %s3236_s14  ;;  %p3242_p7 = scmp.lt.s32.totalorder %s3236_s14, %s3236_s14 }
  0x11   :  { %p3243_p8 = por %p3242_p7, %p3241_p6 }
  0x13   :  { %p3244_p9 = pnand %p3243_p8, %p3237_p5 }
  0x15   :  { %3247 = shalt.err (!%p3244_p9)
}
  0x16   :  { %27 = dma.hbm_to_vmem [thread:$0]  %s3938_s0, 512, %s22_s30, [#allocation3], %s3296_s10, %s3296_s10, %s3297_s11  }
  0x17   :  { %s3298_s17 = smov [#allocation7]  }
  0x18   :  { %s53_s18 = sshll.u32 %s3298_s17, 4  ;;  %s54_s18 = int_to_ptr.vmem [resolvable:$true] %s53_s18 }
  0x19   :  { %s3256_s19 = scalar_lea.vmem %s54_s18, 3072  ;;  %p3261_p11 = scmp.lt.s32.totalorder %s54_s18, %s54_s18 }
  0x1a   :  { %p3257_p10 = scmp.ne.s32.totalorder %s54_s18, %s3256_s19  ;;  %p3262_p12 = scmp.lt.s32.totalorder %s3256_s19, %s3256_s19 }
  0x1c   :  { %p3263_p13 = por %p3262_p12, %p3261_p11 }
  0x1e   :  { %p3264_p0 = pnand %p3263_p13, %p3257_p10 }
  0x20   :  { %3267 = shalt.err (!%p3264_p0)
}
  0x21   :  { %59 = dma.hbm_to_vmem [thread:$0]  %s3944_s6, 3072, %s54_s18, [#allocation6], %s3296_s10, %s3296_s10, %s3297_s11  }
  0x22   :  { %3288 = dma.done.wait [#allocation3], 512  }
  0x23   :  { %3289 = vsyncadd [#allocation3], 4294966784 }
  0x24   :  { %3290 = dma.done.wait [#allocation6], 3584  }
  0x25   :  { %3291 = vsyncadd [#allocation6], 4294963712  ;;  %v3358_v0 = vld [vmem:[#allocation2] sm:$0xff]  ;;  %vm94_vm0 = vcmask 523264   ;;  %v3360_v1 = vld [vmem:[#allocation2 + $0x10] sm:$0xff]  ;;  %v3299_v21 = vmov 0  }
  0x26   :  { %v3362_v2 = vld [vmem:[#allocation2 + $0x8] sm:$0xff]  ;;  %v90_v3 = vmul.f32 %v3358_v0, %v3358_v0  ;;  %v92_v4 = vmul.f32 %v3360_v1, %v3360_v1  ;;  %v3370_v6 = vld [vmem:[#allocation2 + $0x18] sm:$0xff]  ;;  %v2959_v15 = vld [vmem:[%s3943_s5 + $0x34] ss:$12 sps:$4 sm:$0xff]   ;;  %254 = vmatprep.mubr.bf16.mxu0 %v3299_v21  ;;  %vm346_vm1 = vcmask 261120   ;;  %s3300_s14 = smov 64  }
  0x27   :  { %v91_v5 = vmul.f32 %v3362_v2, %v3362_v2  ;;  %v93_v7 = vmul.f32 %v3370_v6, %v3370_v6  ;;  %v2955_v12 = vld [vmem:[%s3943_s5 + $0x4c] ss:$12 sps:$4 sm:$0xff]   ;;  %v2957_v13 = vld [vmem:[%s3943_s5 + $0x48] ss:$12 sps:$4 sm:$0xff]   ;;  %v2958_v14 = vld [vmem:[%s3943_s5 + $0x50] ss:$12 sps:$4 sm:$0xff]  }
  0x28   :  { %v95_v8 = vsel %vm94_vm0, %v90_v3, 0.0  ;;  %v101_v9 = vsel %vm94_vm0, %v92_v4, 0.0  ;;  %v2962_v16 = vld [vmem:[%s3943_s5 + $0x38] ss:$12 sps:$4 sm:$0xff]   ;;  %230 = vmatprep.subr.bf16.mxu0 %v2955_v12  ;;  %2775 = vmatprep.subr.bf16.mxu1 %v2958_v14  ;;  %v2961_v17 = vld [vmem:[%s3943_s5 + $0x30] ss:$12 sps:$4 sm:$0xff]  }
  0x29   :  { %96 = vadd.xlane.f32.xlu0 %v95_v8  ;;  %102 = vadd.xlane.f32.xlu1 %v101_v9  ;;  %v98_v10 = vsel %vm94_vm0, %v91_v5, 0.0  ;;  %v104_v11 = vsel %vm94_vm0, %v93_v7, 0.0  ;;  %v2963_v18 = vld [vmem:[%s3943_s5 + $0x1c] ss:$12 sps:$4 sm:$0xff]   ;;  %v2966_v19 = vld [vmem:[%s3943_s5 + $0x20] ss:$12 sps:$4 sm:$0xff]  }
  0x2a   :  { %231 = vmatpush1.bf16.msra.mxu0 %v2957_v13  ;;  %2776 = vmatpush3.bf16.msra.mxu1 %v2958_v14  ;;  %v2965_v20 = vld [vmem:[%s3943_s5 + $0x18] ss:$12 sps:$4 sm:$0xff]   ;;  %v2970_v23 = vld [vmem:[%s3943_s5 + $0x8] ss:$12 sps:$4 sm:$0xff]   ;;  %v2969_v24 = vld [vmem:[%s3943_s5] ss:$12 sps:$4 sm:$0xff]  }
  0x2b   :  { %232 = vmatprep.subr.bf16.mxu0 %v2959_v15  ;;  %2777 = vmatprep.subr.bf16.mxu1 %v2962_v16  ;;  %v2967_v22 = vld [vmem:[%s3943_s5 + $0x4] ss:$12 sps:$4 sm:$0xff]   ;;  %v2528_v42 = vld [vmem:[%s3942_s4] ss:$0 sm:$0xff]  ;;  %v3440_v58 = vld [vmem:[%s3940_s2 + $0x8] sm:$0xff]  ;;  %s3302_s15 = smov 96  }
  0x2c   :  { %v3430_v54 = vld [vmem:[%s3940_s2 + $0x20] sm:$0xff]  ;;  %v3445_v60 = vld [vmem:[%s3940_s2 + $0x28] sm:$0xff]  ;;  %v3460_v13 = vld [vmem:[%s3940_s2 + $0x30] sm:$0xff]  ;;  %vm2488_vm2 = vcmask 7168   ;;  %vm2506_vm3 = vcmask 0  }
  0x2d   :  { %99 = vadd.xlane.f32.xlu0 %v98_v10  ;;  %105 = vadd.xlane.f32.xlu1 %v104_v11  ;;  %v3435_v57 = vld [vmem:[%s3940_s2] sm:$0xff] }
  0x2e   :  { %233 = vmatpush1.bf16.msra.mxu0 %v2961_v17  ;;  %2778 = vmatpush3.bf16.msra.mxu1 %v2962_v16  ;;  %v3468_v16 = vld [vmem:[%s3940_s2 + $0x10] sm:$0xff]  ;;  %v3473_v17 = vld [vmem:[%s3940_s2 + $0x18] sm:$0xff] }
  0x2f   :  { %234 = vmatprep.subr.bf16.mxu0 %v2963_v18  ;;  %2779 = vmatprep.subr.bf16.mxu1 %v2966_v19 }
  0x32   :  { %235 = vmatpush1.bf16.msra.mxu0 %v2965_v20  ;;  %2780 = vmatpush3.bf16.msra.mxu1 %v2966_v19  ;;  %v3478_v19 = vld [vmem:[%s3940_s2 + $0x38] sm:$0xff]  ;;  %s3301_s2 = smov 32  }
  0x33   :  { %236 = vmatprep.subr.bf16.mxu0 %v2967_v22  ;;  %2781 = vmatprep.subr.bf16.mxu1 %v2970_v23 }
  0x36   :  { %237 = vmatpush1.bf16.msra.mxu0 %v2969_v24  ;;  %2782 = vmatpush3.bf16.msra.mxu1 %v2970_v23 }
  0xb2   :  { %v97_v25 = vpop.xlane.xlu0 %96  ;;  %v103_v26 = vpop.xlane.xlu1 %102 }
  0xb3   :  { %v108_v27 = vmul.f32 0.015625, %v97_v25  ;;  %v110_v28 = vmul.f32 0.015625, %v103_v26 }
  0xb5   :  { %v112_v29 = vadd.f32 1e-06, %v108_v27  ;;  %v114_v30 = vadd.f32 1e-06, %v110_v28 }
  0xb6   :  { %v100_v31 = vpop.xlane.xlu0 %99  ;;  %v106_v32 = vpop.xlane.xlu1 %105 }
  0xb7   :  { %3047 = vrsqrt.f32 %v112_v29  ;;  %v109_v33 = vmul.f32 0.015625, %v100_v31  ;;  %v111_v34 = vmul.f32 0.015625, %v106_v32 }
  0xb8   :  { %3049 = vrsqrt.f32 %v114_v30 }
  0xb9   :  { %v113_v35 = vadd.f32 1e-06, %v109_v33  ;;  %v115_v36 = vadd.f32 1e-06, %v111_v34 }
  0xbb   :  { %3051 = vrsqrt.f32 %v113_v35  ;;  %v3499_v35 = vld [vmem:[#allocation5] sm:$0xff] }
  0xbc   :  { %3053 = vrsqrt.f32 %v115_v36 }
  0xc4   :  { %v3048_v37 = vpop.eup %3047 }
  0xc5   :  { %v3050_v38 = vpop.eup %3049  ;;  %v120_v40 = vmul.f32 %v3048_v37, %v3358_v0 }
  0xc6   :  { %v122_v39 = vmul.f32 %v3050_v38, %v3360_v1  ;;  %v3501_v38 = vld [vmem:[#allocation5 + $0x18] sm:$0xff] }
  0xc7   :  { %v130_v47 = vmul.f32 %v2528_v42, %v120_v40 }
  0xc8   :  { %v3052_v41 = vpop.eup %3051  ;;  %v132_v46 = vmul.f32 %v2528_v42, %v122_v39 }
  0xc9   :  { %v3054_v43 = vpop.eup %3053  ;;  %v121_v44 = vmul.f32 %v3052_v41, %v3362_v2 }
  0xca   :  { %v123_v45 = vmul.f32 %v3054_v43, %v3370_v6 }
  0xcb   :  { %v131_v48 = vmul.f32 %v2528_v42, %v121_v44 }
  0xcc   :  { %v133_v49 = vmul.f32 %v2528_v42, %v123_v45  ;;  %v3504_v42 = vld [vmem:[#allocation5 + $0x8] sm:$0xff] }
  0xcd   :  { %v134_v50 = vpack.c.bf16 %v131_v48, %v130_v47  ;;  %v3508_v47 = vld [vmem:[#allocation5 + $0x10] sm:$0xff] }
  0xce   :  { %v135_v51 = vpack.c.bf16 %v133_v49, %v132_v46 }
  0xcf   :  { %2541 = vmatmul.mubr.msk.bf16.vlgmr.msra.gmra.mxu0 %vm94_vm0, %v134_v50  ;;  %2783 = vmatprep.mubr.msk.bf16.mxu1 %vm94_vm0, %v134_v50 }
  0xd0   :  { %2784 = vmatmul.mubr.msk.bf16.vlgmr.msra.gmra.mxu1 %vm94_vm0, %v135_v51  ;;  %264 = vmatprep.mubr.bf16.mxu0 %v3299_v21 }
  0xd7   :  { %2542 = vmatmul.mubr.msk.bf16.gmra.mxu0 %vm94_vm0, %v135_v51 }
 0x18f   :  { %v256_v52 = vpop.f32.mrf.mxu0 }
 0x190   :  { %v2785_v53 = vpop.f32.mrf.mxu1  ;;  %v324_v4 = vmul.f32 %v256_v52, %v3435_v57 }
 0x191   :  { %v258_v55 = vpop.f32.mrf.mxu0 }
 0x192   :  { %v309_v56 = vpop.f32.mrf.mxu1  ;;  %v328_v61 = vmul.f32 %v3430_v54, %v258_v55 }
 0x193   :  { %v260_v59 = vpop.f32.mrf.mxu0 }
 0x194   :  { %v2786_v62 = vpop.f32.mrf.mxu1  ;;  %v325_v5 = vmul.f32 %v260_v59, %v3440_v58  ;;  %v332_v11 = vadd.f32 %v328_v61, %v324_v4 }
 0x195   :  { %v3448_v63 = vpack.c.bf16 %v2786_v62, %v2785_v53  ;;  %v262_v3 = vpop.f32.mrf.mxu0 }
 0x196   :  { %v329_v7 = vmul.f32 %v3445_v60, %v262_v3  ;;  %v312_v8 = vpop.f32.mrf.mxu1 }
 0x197   :  { %v3453_v9 = vpack.c.bf16 %v312_v8, %v309_v56  ;;  %v266_v10 = vpop.f32.mrf.mxu0  ;;  %2795 = vmatprep.subr.bf16.mxu1 %v3448_v63 }
 0x198   :  { %v333_v12 = vadd.f32 %v329_v7, %v325_v5  ;;  %2796 = vmatpush3.bf16.msra.mxu1 %v3448_v63  ;;  %v326_v23 = vmul.f32 %v266_v10, %v3468_v16 }
 0x199   :  { %v268_v14 = vpop.f32.mrf.mxu0  ;;  %2797 = vmatprep.subr.bf16.mxu1 %v3453_v9 }
 0x19a   :  { %v3463_v15 = vpack.c.bf16 %v333_v12, %v332_v11  ;;  %v330_v20 = vmul.f32 %v3460_v13, %v268_v14 }
 0x19b   :  { %v270_v18 = vpop.f32.mrf.mxu0 }
 0x19c   :  { %2798 = vmatpush3.bf16.msra.mxu1 %v3453_v9  ;;  %342 = vrot.lane.b32.xlu1 %v3463_v15, %s3300_s14  ;;  %v327_v24 = vmul.f32 %v270_v18, %v3473_v17  ;;  %v334_v26 = vadd.f32 %v330_v20, %v326_v23 }
 0x19d   :  { %2791 = vmatprep.mubr.msk.bf16.mxu0 %vm346_vm1, %v3463_v15  ;;  %v272_v22 = vpop.f32.mrf.mxu0 }
 0x19e   :  { %v331_v25 = vmul.f32 %v3478_v19, %v272_v22 }
 0x1a0   :  { %v335_v27 = vadd.f32 %v331_v25, %v327_v24 }
 0x1a2   :  { %v3489_v28 = vpack.c.bf16 %v335_v27, %v334_v26 }
 0x1a4   :  { %344 = vrot.lane.b32.xlu0 %v3489_v28, %s3300_s14 }
 0x20e   :  { %v343_v31 = vpop.permute.xlu1 %342 }
 0x20f   :  { %v354_v32 = vsel %vm346_vm1, %v343_v31, 0 }
 0x216   :  { %v345_v29 = vpop.permute.xlu0 %344 }
 0x217   :  { %v357_v30 = vsel %vm346_vm1, %v345_v29, 0  ;;  %2935 = vmatprep.subr.msk.bf16.mxu0 %vm346_vm1, %v345_v29 }
 0x218   :  { %2788 = vmatpush3.bf16.xpose.msra.mxu0 %v357_v30 }
 0x219   :  { %2936 = vmatprep.subr.msk.bf16.mxu0 %vm346_vm1, %v343_v31 }
 0x220   :  { %2790 = vmatpush3.bf16.xpose.msra.mxu0 %v354_v32 }
 0x227   :  { %2792 = vmatmul.mubr.msk.bf16.vlgmr.msra.gmra.mxu0 %vm346_vm1, %v3489_v28 }
 0x2e7   :  { %v2793_v33 = vpop.f32.mrf.mxu0 }
 0x2e8   :  { %v410_v43 = vmul.f32 0.17677669, %v2793_v33 }
 0x2e9   :  { %v393_v34 = vpop.f32.mrf.mxu0 }
 0x2ea   :  { %v408_v36 = vmul.f32 0.17677669, %v393_v34  ;;  %v414_v51 = vadd.f32 %v410_v43, %v3508_v47 }
 0x2eb   :  { %v2794_v37 = vpop.f32.mrf.mxu0 }
 0x2ec   :  { %v411_v39 = vmul.f32 0.17677669, %v2794_v37  ;;  %v412_v40 = vadd.f32 %v408_v36, %v3499_v35  ;;  %v422_v52 = vsel %vm346_vm1, %v414_v51, -inf }
 0x2ed   :  { %v396_v41 = vpop.f32.mrf.mxu0 }
 0x2ee   :  { %v409_v44 = vmul.f32 0.17677669, %v396_v41  ;;  %v416_v45 = vsel %vm346_vm1, %v412_v40, -inf  ;;  %v415_v46 = vadd.f32 %v411_v39, %v3501_v38 }
 0x2ef   :  { %417 = vmax.xlane.f32.xlu1 %v416_v45 }
 0x2f0   :  { %v413_v48 = vadd.f32 %v409_v44, %v3504_v42  ;;  %v425_v49 = vsel %vm346_vm1, %v415_v46, -inf }
 0x2f2   :  { %v419_v50 = vsel %vm346_vm1, %v413_v48, -inf }
 0x2f3   :  { %426 = vmax.xlane.f32.xlu1 %v425_v49  ;;  %420 = vmax.xlane.f32.xlu0 %v419_v50  ;;  %v2972_v49 = vld [vmem:[%s3945_s7] sm:$0xff]  }
 0x2f7   :  { %423 = vmax.xlane.f32.xlu0 %v422_v52 }
 0x378   :  { %v418_v53 = vpop.xlane.xlu1 %417 }
 0x379   :  { %v428_v62 = vsub.f32 %v412_v40, %v418_v53 }
 0x37b   :  { %v432_v8 = vmul.f32 1.442695, %v428_v62 }
 0x37c   :  { %v427_v55 = vpop.xlane.xlu1 %426  ;;  %v421_v56 = vpop.xlane.xlu0 %420 }
 0x37d   :  { %v431_v59 = vsub.f32 %v415_v46, %v427_v55  ;;  %v429_v61 = vsub.f32 %v413_v48, %v421_v56  ;;  %v2971_v48 = vld [vmem:[%s3945_s7 + $0x8] sm:$0xff]  }
 0x37f   :  { %v434_v3 = vmul.f32 1.442695, %v429_v61  ;;  %v438_v4 = vmul.f32 1.442695, %v431_v59 }
 0x380   :  { %v424_v5 = vpop.xlane.xlu0 %423 }
 0x381   :  { %v430_v7 = vsub.f32 %v414_v51, %v424_v5  ;;  %3055 = vpow2.f32 %v434_v3 }
 0x382   :  { %3057 = vpow2.f32 %v438_v4 }
 0x383   :  { %v436_v10 = vmul.f32 1.442695, %v430_v7 }
 0x385   :  { %3059 = vpow2.f32 %v436_v10 }
 0x386   :  { %3061 = vpow2.f32 %v432_v8 }
 0x38e   :  { %v3056_v11 = vpop.eup %3055 }
 0x38f   :  { %v443_v12 = vsel %vm346_vm1, %v3056_v11, 0.0  ;;  %v3058_v14 = vpop.eup %3057 }
 0x390   :  { %444 = vadd.xlane.f32.xlu1 %v443_v12  ;;  %v449_v23 = vsel %vm346_vm1, %v3058_v14, 0.0 }
 0x392   :  { %v3060_v18 = vpop.eup %3059 }
 0x393   :  { %v446_v20 = vsel %vm346_vm1, %v3060_v18, 0.0  ;;  %v3062_v22 = vpop.eup %3061 }
 0x394   :  { %447 = vadd.xlane.f32.xlu0 %v446_v20  ;;  %450 = vadd.xlane.f32.xlu1 %v449_v23  ;;  %v440_v24 = vsel %vm346_vm1, %v3062_v22, 0.0 }
 0x398   :  { %441 = vadd.xlane.f32.xlu0 %v440_v24 }
 0x3a5   :  { %527 = vrot.lane.b32.xlu1 %v3463_v15, %s3301_s2 }
 0x3a9   :  { %523 = vrot.lane.b32.xlu1 %v3463_v15, %s3302_s15 }
 0x3ad   :  { %525 = vrot.lane.b32.xlu1 %v3489_v28, %s3302_s15 }
 0x3ae   :  { %529 = vrot.lane.b32.xlu0 %v3489_v28, %s3301_s2 }
 0x419   :  { %v445_v25 = vpop.xlane.xlu1 %444 }
 0x41d   :  { %v448_v26 = vpop.xlane.xlu0 %447  ;;  %v451_v27 = vpop.xlane.xlu1 %450 }
 0x41e   :  { %3063 = vrcp.f32 %v448_v26 }
 0x41f   :  { %3065 = vrcp.f32 %v451_v27 }
 0x420   :  { %3067 = vrcp.f32 %v445_v25 }
 0x421   :  { %v442_v29 = vpop.xlane.xlu0 %441  ;;  %v528_v34 = vpop.permute.xlu1 %527 }
 0x422   :  { %3069 = vrcp.f32 %v442_v29  ;;  %v538_v45 = vsel %vm346_vm1, %v528_v34, 0 }
 0x425   :  { %v530_v30 = vpop.permute.xlu0 %529  ;;  %v524_v43 = vpop.permute.xlu1 %523 }
 0x426   :  { %2937 = vmatprep.subr.msk.bf16.mxu1 %vm346_vm1, %v530_v30  ;;  %v541_v44 = vsel %vm346_vm1, %v530_v30, 0 }
 0x429   :  { %v526_v46 = vpop.permute.xlu1 %525 }
 0x42b   :  { %v3064_v31 = vpop.eup %3063 }
 0x42c   :  { %v3066_v32 = vpop.eup %3065  ;;  %v458_v36 = vmul.f32 %v3064_v31, %v3060_v18 }
 0x42d   :  { %v3068_v15 = vpop.eup %3067  ;;  %v459_v37 = vmul.f32 %v3066_v32, %v3058_v14 }
 0x42e   :  { %v457_v28 = vmul.f32 %v3068_v15, %v3056_v11 }
 0x42f   :  { %v3070_v33 = vpop.eup %3069  ;;  %v461_v41 = vpack.c.bf16 %v459_v37, %v458_v36 }
 0x430   :  { %v456_v39 = vmul.f32 %v3070_v33, %v3062_v22 }
 0x432   :  { %v460_v40 = vpack.c.bf16 %v457_v28, %v456_v39 }
 0x434   :  { %2799 = vmatprep.mubr.msk.bf16.mxu1 %vm346_vm1, %v460_v40 }
 0x435   :  { %2800 = vmatmul.mubr.msk.bf16.vlgmr.msra.gmra.mxu1 %vm346_vm1, %v461_v41 }
 0x436   :  { %2804 = vmatpush3.bf16.xpose.msra.mxu1 %v541_v44  ;;  %2807 = vmatprep.mubr.msk.bf16.mxu1 %vm346_vm1, %v524_v43 }
 0x437   :  { %2938 = vmatprep.subr.msk.bf16.mxu1 %vm346_vm1, %v528_v34 }
 0x43e   :  { %2806 = vmatpush3.bf16.xpose.msra.mxu1 %v538_v45 }
 0x43f   :  { %2827 = vmatprep.subr.bf16.mxu1 %v2971_v48 }
 0x445   :  { %2808 = vmatmul.mubr.msk.bf16.vlgmr.msra.gmra.mxu1 %vm346_vm1, %v526_v46 }
 0x446   :  { %2828 = vmatpush3.bf16.msra.mxu1 %v2971_v48 }
 0x447   :  { %2829 = vmatprep.subr.bf16.mxu1 %v2972_v49 }
 0x44a   :  { %2830 = vmatpush3.bf16.msra.mxu1 %v2972_v49 }
 0x4f5   :  { %v2801_v50 = vpop.f32.mrf.mxu1 }
 0x4f7   :  { %v502_v51 = vpop.f32.mrf.mxu1 }
 0x4f9   :  { %v2802_v52 = vpop.f32.mrf.mxu1 }
 0x4fa   :  { %v518_v56 = vpack.c.bf16 %v2802_v52, %v2801_v50 }
 0x4fb   :  { %v505_v53 = vpop.f32.mrf.mxu1 }
 0x4fc   :  { %v517_v55 = vpack.c.bf16 %v505_v53, %v502_v51 }
 0x4fe   :  { %2831 = vmatprep.mubr.msk.bf16.mxu1 %vm346_vm1, %v517_v55 }
 0x4ff   :  { %2832 = vmatmul.mubr.msk.bf16.vlgmr.msra.gmra.mxu1 %vm346_vm1, %v518_v56 }
 0x505   :  { %v2809_v59 = vpop.f32.mrf.mxu1 }
 0x506   :  { %v594_v62 = vmul.f32 0.17677669, %v2809_v59 }
 0x507   :  { %v577_v61 = vpop.f32.mrf.mxu1 }
 0x508   :  { %v592_v3 = vmul.f32 0.17677669, %v577_v61  ;;  %v598_v12 = vadd.f32 %v594_v62, %v3508_v47 }
 0x509   :  { %v2810_v4 = vpop.f32.mrf.mxu1 }
 0x50a   :  { %v596_v5 = vadd.f32 %v592_v3, %v3499_v35  ;;  %v595_v8 = vmul.f32 0.17677669, %v2810_v4  ;;  %v606_v18 = vsel %vm346_vm1, %v598_v12, -inf }
 0x50b   :  { %v580_v7 = vpop.f32.mrf.mxu1 }
 0x50c   :  { %v593_v10 = vmul.f32 0.17677669, %v580_v7  ;;  %v600_v11 = vsel %vm346_vm1, %v596_v5, -inf  ;;  %v599_v22 = vadd.f32 %v595_v8, %v3501_v38  ;;  %v2974_v7 = vld [vmem:[%s3945_s7 + $0x10] sm:$0xff]  }
 0x50d   :  { %601 = vmax.xlane.f32.xlu0 %v600_v11 }
 0x50e   :  { %v597_v14 = vadd.f32 %v593_v10, %v3504_v42  ;;  %v609_v23 = vsel %vm346_vm1, %v599_v22, -inf }
 0x510   :  { %v603_v20 = vsel %vm346_vm1, %v597_v14, -inf }
 0x511   :  { %607 = vmax.xlane.f32.xlu0 %v606_v18  ;;  %604 = vmax.xlane.f32.xlu1 %v603_v20 }
 0x515   :  { %610 = vmax.xlane.f32.xlu0 %v609_v23 }
 0x596   :  { %v602_v24 = vpop.xlane.xlu0 %601 }
 0x597   :  { %v612_v25 = vsub.f32 %v596_v5, %v602_v24  ;;  %v2973_v5 = vld [vmem:[%s3945_s7 + $0x18] sm:$0xff]  }
 0x599   :  { %v616_v30 = vmul.f32 1.442695, %v612_v25 }
 0x59a   :  { %v608_v26 = vpop.xlane.xlu0 %607  ;;  %v605_v27 = vpop.xlane.xlu1 %604 }
 0x59b   :  { %v614_v29 = vsub.f32 %v598_v12, %v608_v26  ;;  %v613_v32 = vsub.f32 %v597_v14, %v605_v27 }
 0x59d   :  { %v620_v31 = vmul.f32 1.442695, %v614_v29  ;;  %v618_v34 = vmul.f32 1.442695, %v613_v32 }
 0x59e   :  { %v611_v15 = vpop.xlane.xlu0 %610 }
 0x59f   :  { %3071 = vpow2.f32 %v620_v31  ;;  %v615_v33 = vsub.f32 %v599_v22, %v611_v15 }
 0x5a0   :  { %3073 = vpow2.f32 %v616_v30 }
 0x5a1   :  { %v622_v36 = vmul.f32 1.442695, %v615_v33 }
 0x5a3   :  { %3075 = vpow2.f32 %v622_v36 }
 0x5a4   :  { %3077 = vpow2.f32 %v618_v34 }
 0x5ac   :  { %v3072_v37 = vpop.eup %3071 }
 0x5ad   :  { %v630_v39 = vsel %vm346_vm1, %v3072_v37, 0.0  ;;  %v3074_v28 = vpop.eup %3073 }
 0x5ae   :  { %631 = vadd.xlane.f32.xlu0 %v630_v39  ;;  %v624_v41 = vsel %vm346_vm1, %v3074_v28, 0.0 }
 0x5b0   :  { %v3076_v40 = vpop.eup %3075 }
 0x5b1   :  { %v633_v43 = vsel %vm346_vm1, %v3076_v40, 0.0  ;;  %v3078_v44 = vpop.eup %3077 }
 0x5b2   :  { %625 = vadd.xlane.f32.xlu0 %v624_v41  ;;  %634 = vadd.xlane.f32.xlu1 %v633_v43  ;;  %v627_v45 = vsel %vm346_vm1, %v3078_v44, 0.0  ;;  %v2977_v43 = vld [vmem:[#allocation7 + $0x34] ss:$8 sps:$4 sm:$0xff]  }
 0x5b6   :  { %628 = vadd.xlane.f32.xlu1 %v627_v45  ;;  %v2980_v45 = vld [vmem:[#allocation7 + $0x24] ss:$8 sps:$4 sm:$0xff]  }
 0x5bf   :  { %v2833_v20 = vpop.f32.mrf.mxu1 }
 0x5c1   :  { %v834_v22 = vpop.f32.mrf.mxu1 }
 0x5c3   :  { %v2834_v24 = vpop.f32.mrf.mxu1 }
 0x5c5   :  { %v837_v32 = vpop.f32.mrf.mxu1 }
 0x5c7   :  { %648 = vrot.lane.b32.xlu1 %v3453_v9, %s3302_s15 }
 0x5c8   :  { %650 = vrot.lane.b32.xlu0 %v3448_v63, %s3302_s15 }
 0x637   :  { %v632_v46 = vpop.xlane.xlu0 %631 }
 0x63b   :  { %v626_v48 = vpop.xlane.xlu0 %625  ;;  %v635_v49 = vpop.xlane.xlu1 %634 }
 0x63c   :  { %3079 = vrcp.f32 %v635_v49  ;;  %v2981_v49 = vld [vmem:[#allocation7 + $0x10] ss:$8 sps:$4 sm:$0xff]  }
 0x63d   :  { %3081 = vrcp.f32 %v626_v48  ;;  %v2983_v48 = vld [vmem:[#allocation7 + $0x14] ss:$8 sps:$4 sm:$0xff]  }
 0x63e   :  { %3083 = vrcp.f32 %v632_v46  ;;  %v2978_v46 = vld [vmem:[#allocation7 + $0x20] ss:$8 sps:$4 sm:$0xff]  }
 0x63f   :  { %v651_v50 = vpop.permute.xlu0 %650  ;;  %v629_v51 = vpop.xlane.xlu1 %628 }
 0x640   :  { %3085 = vrcp.f32 %v629_v51  ;;  %2811 = vmatprep.subr.bf16.mxu0 %v651_v50  ;;  %v2986_v51 = vld [vmem:[#allocation7 + $0x4] ss:$8 sps:$4 sm:$0xff]  }
 0x641   :  { %2812 = vmatpush3.bf16.msra.mxu0 %v651_v50  ;;  %v2984_v50 = vld [vmem:[#allocation7] ss:$8 sps:$4 sm:$0xff]  }
 0x643   :  { %v649_v52 = vpop.permute.xlu1 %648 }
 0x644   :  { %2813 = vmatprep.subr.bf16.mxu0 %v649_v52 }
 0x645   :  { %2814 = vmatpush3.bf16.msra.mxu0 %v649_v52 }
 0x646   :  { %2819 = vmatprep.subr.bf16.mxu0 %v2973_v5 }
 0x649   :  { %v3080_v53 = vpop.eup %3079 }
 0x64a   :  { %v3082_v55 = vpop.eup %3081  ;;  %v643_v59 = vmul.f32 %v3080_v53, %v3076_v40 }
 0x64b   :  { %v3084_v9 = vpop.eup %3083  ;;  %v640_v63 = vmul.f32 %v3082_v55, %v3074_v28 }
 0x64c   :  { %v642_v62 = vmul.f32 %v3084_v9, %v3072_v37 }
 0x64d   :  { %v3086_v56 = vpop.eup %3085 }
 0x64e   :  { %v641_v61 = vmul.f32 %v3086_v56, %v3078_v44  ;;  %v645_v4 = vpack.c.bf16 %v643_v59, %v642_v62  ;;  %v2975_v44 = vld [vmem:[#allocation7 + $0x30] ss:$8 sps:$4 sm:$0xff]  }
 0x650   :  { %v644_v3 = vpack.c.bf16 %v641_v61, %v640_v63 }
 0x652   :  { %2815 = vmatprep.mubr.msk.bf16.mxu0 %vm346_vm1, %v644_v3 }
 0x653   :  { %2816 = vmatmul.mubr.msk.bf16.vlgmr.msra.gmra.mxu0 %vm346_vm1, %v645_v4 }
 0x654   :  { %2820 = vmatpush3.bf16.msra.mxu0 %v2973_v5 }
 0x655   :  { %2821 = vmatprep.subr.bf16.mxu0 %v2974_v7 }
 0x658   :  { %2822 = vmatpush3.bf16.msra.mxu0 %v2974_v7 }
 0x659   :  { %961 = vmatprep.subr.bf16.mxu0 %v2977_v43 }
 0x713   :  { %v2817_v8 = vpop.f32.mrf.mxu0 }
 0x715   :  { %v694_v10 = vpop.f32.mrf.mxu0 }
 0x717   :  { %v2818_v11 = vpop.f32.mrf.mxu0 }
 0x718   :  { %v710_v18 = vpack.c.bf16 %v2818_v11, %v2817_v8  ;;  %v2562_v11 = vld [vmem:[%s3942_s4 + $0x1] ss:$0 sm:$0xff] }
 0x719   :  { %v697_v12 = vpop.f32.mrf.mxu0 }
 0x71a   :  { %v709_v14 = vpack.c.bf16 %v697_v12, %v694_v10 }
 0x71c   :  { %2823 = vmatprep.mubr.msk.bf16.mxu0 %vm346_vm1, %v709_v14 }
 0x71d   :  { %2824 = vmatmul.mubr.msk.bf16.vlgmr.msra.gmra.mxu0 %vm346_vm1, %v710_v18 }
 0x71e   :  { %985 = vmatprep.mubr.bf16.mxu0 %v3299_v21  ;;  %962 = vmatpush1.bf16.msra.mxu0 %v2975_v44 }
 0x71f   :  { %963 = vmatprep.subr.bf16.mxu0 %v2980_v45 }
 0x722   :  { %964 = vmatpush1.bf16.msra.mxu0 %v2978_v46 }
 0x723   :  { %965 = vmatprep.subr.bf16.mxu0 %v2983_v48 }
 0x726   :  { %966 = vmatpush1.bf16.msra.mxu0 %v2981_v49 }
 0x727   :  { %967 = vmatprep.subr.bf16.mxu0 %v2986_v51 }
 0x72a   :  { %968 = vmatpush1.bf16.msra.mxu0 %v2984_v50 }
 0x7dd   :  { %v2825_v23 = vpop.f32.mrf.mxu0 }
 0x7de   :  { %v843_v29 = vadd.f32 %v2833_v20, %v2825_v23 }
 0x7df   :  { %v767_v25 = vpop.f32.mrf.mxu0 }
 0x7e0   :  { %v835_v26 = vadd.f32 %v834_v22, %v767_v25  ;;  %v3579_v37 = vadd.f32 %v843_v29, %v3360_v1 }
 0x7e1   :  { %v2826_v27 = vpop.f32.mrf.mxu0 }
 0x7e2   :  { %v3571_v30 = vadd.f32 %v835_v26, %v3358_v0  ;;  %v846_v31 = vadd.f32 %v2834_v24, %v2826_v27  ;;  %v857_v1 = vmul.f32 %v3579_v37, %v3579_v37 }
 0x7e3   :  { %v770_v15 = vpop.f32.mrf.mxu0 }
 0x7e4   :  { %v3574_v33 = vadd.f32 %v846_v31, %v3370_v6  ;;  %v838_v34 = vadd.f32 %v837_v32, %v770_v15  ;;  %v855_v36 = vmul.f32 %v3571_v30, %v3571_v30  ;;  %v2987_v31 = vld [vmem:[%s3945_s7 + $0x58] sm:$0xff]   ;;  %v2988_v32 = vld [vmem:[%s3945_s7 + $0x50] sm:$0xff]   ;;  %v2989_v15 = vld [vmem:[%s3945_s7 + $0x48] sm:$0xff]  }
 0x7e5   :  { %2835 = vmatprep.subr.bf16.mxu1 %v2987_v31 }
 0x7e6   :  { %v3582_v39 = vadd.f32 %v838_v34, %v3362_v2  ;;  %v859_v28 = vsel %vm94_vm0, %v855_v36, 0.0  ;;  %v858_v0 = vmul.f32 %v3574_v33, %v3574_v33  ;;  %v865_v2 = vsel %vm94_vm0, %v857_v1, 0.0  ;;  %2836 = vmatpush3.bf16.msra.mxu1 %v2987_v31  ;;  %v2990_v34 = vld [vmem:[%s3945_s7 + $0x40] sm:$0xff]   ;;  %v2991_v36 = vld [vmem:[%s3945_s7 + $0x38] sm:$0xff]  }
 0x7e7   :  { %860 = vadd.xlane.f32.xlu1 %v859_v28  ;;  %2837 = vmatprep.subr.bf16.mxu1 %v2988_v32  ;;  %v2992_v28 = vld [vmem:[%s3945_s7 + $0x30] sm:$0xff]  }
 0x7e8   :  { %v856_v6 = vmul.f32 %v3582_v39, %v3582_v39  ;;  %v868_v40 = vsel %vm94_vm0, %v858_v0, 0.0  ;;  %v2993_v0 = vld [vmem:[%s3945_s7 + $0x28] sm:$0xff]  }
 0x7ea   :  { %v862_v41 = vsel %vm94_vm0, %v856_v6, 0.0  ;;  %2838 = vmatpush3.bf16.msra.mxu1 %v2988_v32  ;;  %v2994_v6 = vld [vmem:[%s3945_s7 + $0x20] sm:$0xff]  }
 0x7eb   :  { %869 = vadd.xlane.f32.xlu1 %v868_v40  ;;  %863 = vadd.xlane.f32.xlu0 %v862_v41 }
 0x7ec   :  { %2839 = vmatprep.subr.bf16.mxu1 %v2989_v15 }
 0x7ee   :  { %2840 = vmatpush3.bf16.msra.mxu1 %v2989_v15 }
 0x7ef   :  { %866 = vadd.xlane.f32.xlu0 %v865_v2  ;;  %2841 = vmatprep.subr.bf16.mxu1 %v2990_v34 }
 0x7f2   :  { %2842 = vmatpush3.bf16.msra.mxu1 %v2990_v34 }
 0x7f3   :  { %2843 = vmatprep.subr.bf16.mxu1 %v2991_v36 }
 0x7f6   :  { %2844 = vmatpush3.bf16.msra.mxu1 %v2991_v36 }
 0x7f7   :  { %2845 = vmatprep.subr.bf16.mxu1 %v2992_v28 }
 0x7fa   :  { %2846 = vmatpush3.bf16.msra.mxu1 %v2992_v28 }
 0x7fb   :  { %2847 = vmatprep.subr.bf16.mxu1 %v2993_v0 }
 0x7fe   :  { %2848 = vmatpush3.bf16.msra.mxu1 %v2993_v0 }
 0x7ff   :  { %2849 = vmatprep.subr.bf16.mxu1 %v2994_v6 }
 0x802   :  { %2850 = vmatpush3.bf16.msra.mxu1 %v2994_v6  ;;  %v2997_v6 = vld [vmem:[%s3943_s5 + $0xac] ss:$12 sps:$4 sm:$0xff]  }
 0x803   :  { %1298 = vmatprep.subr.bf16.mxu0 %v2997_v6 }
 0x870   :  { %v861_v52 = vpop.xlane.xlu1 %860 }
 0x871   :  { %v871_v53 = vmul.f32 0.015625, %v861_v52 }
 0x873   :  { %v875_v55 = vadd.f32 1e-06, %v871_v53 }
 0x874   :  { %v870_v9 = vpop.xlane.xlu1 %869  ;;  %v864_v56 = vpop.xlane.xlu0 %863 }
 0x875   :  { %v872_v59 = vmul.f32 0.015625, %v864_v56  ;;  %3087 = vrsqrt.f32 %v875_v55  ;;  %v874_v63 = vmul.f32 0.015625, %v870_v9 }
 0x877   :  { %v876_v61 = vadd.f32 1e-06, %v872_v59  ;;  %v878_v4 = vadd.f32 1e-06, %v874_v63 }
 0x878   :  { %v867_v62 = vpop.xlane.xlu0 %866 }
 0x879   :  { %v873_v3 = vmul.f32 0.015625, %v867_v62  ;;  %3089 = vrsqrt.f32 %v876_v61 }
 0x87b   :  { %v877_v5 = vadd.f32 1e-06, %v873_v3 }
 0x87d   :  { %3091 = vrsqrt.f32 %v877_v5 }
 0x87e   :  { %3093 = vrsqrt.f32 %v878_v4 }
 0x882   :  { %v3088_v7 = vpop.eup %3087 }
 0x883   :  { %v883_v8 = vmul.f32 %v3088_v7, %v3571_v30 }
 0x885   :  { %v893_v18 = vmul.f32 %v2562_v11, %v883_v8 }
 0x886   :  { %v3090_v10 = vpop.eup %3089 }
 0x887   :  { %v884_v12 = vmul.f32 %v3090_v10, %v3582_v39 }
 0x889   :  { %v894_v20 = vmul.f32 %v2562_v11, %v884_v12 }
 0x88a   :  { %v3092_v14 = vpop.eup %3091 }
 0x88b   :  { %v3094_v22 = vpop.eup %3093  ;;  %v897_v23 = vpack.c.bf16 %v894_v20, %v893_v18  ;;  %v885_v24 = vmul.f32 %v3092_v14, %v3579_v37 }
 0x88c   :  { %v886_v25 = vmul.f32 %v3094_v22, %v3574_v33 }
 0x88d   :  { %2571 = vmatmul.mubr.msk.bf16.vlgmr.msra.gmra.mxu0 %vm94_vm0, %v897_v23  ;;  %v895_v26 = vmul.f32 %v2562_v11, %v885_v24 }
 0x88e   :  { %995 = vmatprep.mubr.bf16.mxu0 %v3299_v21  ;;  %v896_v27 = vmul.f32 %v2562_v11, %v886_v25 }
 0x890   :  { %v898_v29 = vpack.c.bf16 %v896_v27, %v895_v26 }
 0x895   :  { %2572 = vmatmul.mubr.msk.bf16.gmra.mxu0 %vm94_vm0, %v898_v29 }
 0x896   :  { %1322 = vmatprep.mubr.bf16.mxu0 %v3299_v21 }
 0x94d   :  { %v987_v40 = vpop.f32.mrf.mxu0 }
 0x94e   :  { %v2573_v41 = vmul.f32 -1.442695, %v987_v40 }
 0x94f   :  { %v989_v1 = vpop.f32.mrf.mxu0 }
 0x950   :  { %3095 = vpow2.f32 %v2573_v41  ;;  %v3000_v41 = vld [vmem:[%s3943_s5 + $0x94] ss:$12 sps:$4 sm:$0xff]  }
 0x951   :  { %v991_v2 = vpop.f32.mrf.mxu0 }
 0x952   :  { %v2574_v43 = vmul.f32 -1.442695, %v991_v2 }
 0x953   :  { %v993_v44 = vpop.f32.mrf.mxu0 }
 0x954   :  { %3097 = vpow2.f32 %v2574_v43  ;;  %v3001_v43 = vld [vmem:[%s3943_s5 + $0x78] ss:$12 sps:$4 sm:$0xff]  }
 0x955   :  { %v997_v45 = vpop.f32.mrf.mxu0 }
 0x956   :  { %v2575_v46 = vmul.f32 -1.442695, %v997_v45 }
 0x957   :  { %v999_v48 = vpop.f32.mrf.mxu0 }
 0x958   :  { %3099 = vpow2.f32 %v2575_v46  ;;  %v3007_v46 = vld [vmem:[%s3943_s5 + $0xb0] ss:$12 sps:$4 sm:$0xff]  }
 0x959   :  { %v1001_v49 = vpop.f32.mrf.mxu0 }
 0x95a   :  { %v2576_v50 = vmul.f32 -1.442695, %v1001_v49 }
 0x95b   :  { %v1003_v18 = vpop.f32.mrf.mxu0 }
 0x95c   :  { %3101 = vpow2.f32 %v2576_v50 }
 0x95d   :  { %v3096_v51 = vpop.eup %3095 }
 0x95e   :  { %v1018_v52 = vadd.f32 1.0, %v3096_v51 }
 0x960   :  { %3103 = vrcp.f32 %v1018_v52 }
 0x961   :  { %v3098_v53 = vpop.eup %3097 }
 0x962   :  { %v1019_v55 = vadd.f32 1.0, %v3098_v53 }
 0x964   :  { %3105 = vrcp.f32 %v1019_v55 }
 0x965   :  { %v3100_v9 = vpop.eup %3099 }
 0x966   :  { %v1020_v56 = vadd.f32 1.0, %v3100_v9 }
 0x968   :  { %3107 = vrcp.f32 %v1020_v56 }
 0x969   :  { %v3102_v59 = vpop.eup %3101 }
 0x96a   :  { %v1021_v63 = vadd.f32 1.0, %v3102_v59 }
 0x96c   :  { %3109 = vrcp.f32 %v1021_v63 }
 0x96d   :  { %v3104_v61 = vpop.eup %3103 }
 0x96e   :  { %v1030_v62 = vmul.f32 %v3104_v61, %v987_v40  ;;  %v2995_v40 = vld [vmem:[%s3943_s5 + $0xa8] ss:$12 sps:$4 sm:$0xff]  }
 0x96f   :  { %1299 = vmatpush1.bf16.msra.mxu0 %v2995_v40 }
 0x970   :  { %v1034_v5 = vmul.f32 %v1030_v62, %v989_v1  ;;  %v2998_v1 = vld [vmem:[%s3943_s5 + $0x90] ss:$12 sps:$4 sm:$0xff]   ;;  %1300 = vmatprep.subr.bf16.mxu0 %v3000_v41 }
 0x971   :  { %v3106_v3 = vpop.eup %3105 }
 0x972   :  { %v1031_v4 = vmul.f32 %v3106_v3, %v991_v2  ;;  %v3003_v2 = vld [vmem:[%s3943_s5 + $0x7c] ss:$12 sps:$4 sm:$0xff]  }
 0x973   :  { %1301 = vmatpush1.bf16.msra.mxu0 %v2998_v1 }
 0x974   :  { %v1035_v7 = vmul.f32 %v1031_v4, %v993_v44  ;;  %1302 = vmatprep.subr.bf16.mxu0 %v3003_v2  ;;  %v3006_v44 = vld [vmem:[%s3943_s5 + $0x64] ss:$12 sps:$4 sm:$0xff]  }
 0x975   :  { %v3108_v8 = vpop.eup %3107 }
 0x976   :  { %v1038_v10 = vpack.c.bf16 %v1035_v7, %v1034_v5  ;;  %v1032_v11 = vmul.f32 %v3108_v8, %v997_v45  ;;  %v3004_v45 = vld [vmem:[%s3943_s5 + $0x60] ss:$12 sps:$4 sm:$0xff]  }
 0x977   :  { %1303 = vmatpush1.bf16.msra.mxu0 %v3001_v43  ;;  %v2586_v5 = vld [vmem:[%s3942_s4 + $0x2] ss:$0 sm:$0xff] }
 0x978   :  { %2851 = vmatprep.mubr.bf16.mxu1 %v1038_v10  ;;  %v1036_v20 = vmul.f32 %v1032_v11, %v999_v48  ;;  %1304 = vmatprep.subr.bf16.mxu0 %v3006_v44 }
 0x979   :  { %v3110_v12 = vpop.eup %3109 }
 0x97a   :  { %v1033_v14 = vmul.f32 %v3110_v12, %v1001_v49 }
 0x97b   :  { %1305 = vmatpush1.bf16.msra.mxu0 %v3004_v45 }
 0x97c   :  { %v1037_v22 = vmul.f32 %v1033_v14, %v1003_v18  ;;  %2855 = vmatprep.subr.bf16.mxu0 %v3007_v46  ;;  %v3008_v18 = vld [vmem:[%s3943_s5 + $0x98] ss:$12 sps:$4 sm:$0xff]  }
 0x97e   :  { %v1039_v23 = vpack.c.bf16 %v1037_v22, %v1036_v20 }
 0x980   :  { %2852 = vmatmul.mubr.bf16.vlgmr.msra.gmra.mxu1 %v1039_v23 }
 0xa40   :  { %v2853_v24 = vpop.f32.mrf.mxu1 }
 0xa41   :  { %v3630_v26 = vadd.f32 %v2853_v24, %v3579_v37  ;;  %v3009_v24 = vld [vmem:[%s3943_s5 + $0x80] ss:$12 sps:$4 sm:$0xff]  }
 0xa42   :  { %v1138_v25 = vpop.f32.mrf.mxu1 }
 0xa43   :  { %v3633_v27 = vadd.f32 %v1138_v25, %v3571_v30  ;;  %v1161_v37 = vmul.f32 %v3630_v26, %v3630_v26 }
 0xa44   :  { %v2854_v29 = vpop.f32.mrf.mxu1 }
 0xa45   :  { %v1159_v31 = vmul.f32 %v3633_v27, %v3633_v27  ;;  %v3638_v15 = vadd.f32 %v2854_v29, %v3574_v33  ;;  %v1169_v28 = vsel %vm94_vm0, %v1161_v37, 0.0 }
 0xa46   :  { %v1141_v32 = vpop.f32.mrf.mxu1 }
 0xa47   :  { %v3641_v34 = vadd.f32 %v1141_v32, %v3582_v39  ;;  %v1163_v36 = vsel %vm94_vm0, %v1159_v31, 0.0  ;;  %v1162_v33 = vmul.f32 %v3638_v15, %v3638_v15  ;;  %v3010_v31 = vld [vmem:[%s3943_s5 + $0x68] ss:$12 sps:$4 sm:$0xff]  }
 0xa48   :  { %1164 = vadd.xlane.f32.xlu0 %v1163_v36 }
 0xa49   :  { %v1160_v30 = vmul.f32 %v3641_v34, %v3641_v34  ;;  %v1172_v39 = vsel %vm94_vm0, %v1162_v33, 0.0 }
 0xa4b   :  { %v1166_v0 = vsel %vm94_vm0, %v1160_v30, 0.0 }
 0xa4c   :  { %1170 = vadd.xlane.f32.xlu0 %v1169_v28  ;;  %1167 = vadd.xlane.f32.xlu1 %v1166_v0 }
 0xa50   :  { %1173 = vadd.xlane.f32.xlu1 %v1172_v39 }
 0xad1   :  { %v1165_v48 = vpop.xlane.xlu0 %1164 }
 0xad2   :  { %v1175_v49 = vmul.f32 0.015625, %v1165_v48 }
 0xad4   :  { %v1179_v50 = vadd.f32 1e-06, %v1175_v49 }
 0xad5   :  { %v1171_v51 = vpop.xlane.xlu0 %1170  ;;  %v1168_v52 = vpop.xlane.xlu1 %1167 }
 0xad6   :  { %v1176_v53 = vmul.f32 0.015625, %v1168_v52  ;;  %3111 = vrsqrt.f32 %v1179_v50  ;;  %v1177_v55 = vmul.f32 0.015625, %v1171_v51 }
 0xad8   :  { %v1180_v9 = vadd.f32 1e-06, %v1176_v53  ;;  %v1181_v63 = vadd.f32 1e-06, %v1177_v55 }
 0xad9   :  { %v1174_v56 = vpop.xlane.xlu1 %1173 }
 0xada   :  { %v1178_v59 = vmul.f32 0.015625, %v1174_v56  ;;  %3113 = vrsqrt.f32 %v1180_v9 }
 0xadc   :  { %v1182_v61 = vadd.f32 1e-06, %v1178_v59 }
 0xade   :  { %3115 = vrsqrt.f32 %v1182_v61 }
 0xadf   :  { %3117 = vrsqrt.f32 %v1181_v63 }
 0xae3   :  { %v3112_v62 = vpop.eup %3111 }
 0xae4   :  { %v1187_v3 = vmul.f32 %v3112_v62, %v3633_v27 }
 0xae6   :  { %v1197_v10 = vmul.f32 %v2586_v5, %v1187_v3 }
 0xae7   :  { %v3114_v4 = vpop.eup %3113 }
 0xae8   :  { %v1188_v7 = vmul.f32 %v3114_v4, %v3641_v34 }
 0xaea   :  { %v1198_v11 = vmul.f32 %v2586_v5, %v1188_v7 }
 0xaeb   :  { %v3116_v8 = vpop.eup %3115 }
 0xaec   :  { %v3118_v12 = vpop.eup %3117  ;;  %v1201_v14 = vpack.c.bf16 %v1198_v11, %v1197_v10  ;;  %v1190_v20 = vmul.f32 %v3116_v8, %v3638_v15 }
 0xaed   :  { %v1189_v22 = vmul.f32 %v3118_v12, %v3630_v26 }
 0xaee   :  { %2615 = vmatmul.mubr.msk.bf16.vlgmr.msra.gmra.mxu0 %vm94_vm0, %v1201_v14  ;;  %v1200_v23 = vmul.f32 %v2586_v5, %v1190_v20 }
 0xaef   :  { %2856 = vmatpush3.bf16.msra.mxu0 %v3007_v46  ;;  %1332 = vmatprep.mubr.bf16.mxu0 %v3299_v21  ;;  %v1199_v25 = vmul.f32 %v2586_v5, %v1189_v22 }
 0xaf0   :  { %2857 = vmatprep.subr.bf16.mxu0 %v3008_v18 }
 0xaf1   :  { %v1202_v29 = vpack.c.bf16 %v1200_v23, %v1199_v25 }
 0xaf3   :  { %2858 = vmatpush3.bf16.msra.mxu0 %v3008_v18 }
 0xaf4   :  { %2859 = vmatprep.subr.bf16.mxu0 %v3009_v24 }
 0xaf6   :  { %2616 = vmatmul.mubr.msk.bf16.gmra.mxu0 %vm94_vm0, %v1202_v29 }
 0xaf7   :  { %2860 = vmatpush3.bf16.msra.mxu0 %v3009_v24  ;;  %2863 = vmatprep.mubr.msk.bf16.mxu0 %vm94_vm0, %v1201_v14 }
 0xaf8   :  { %2861 = vmatprep.subr.bf16.mxu0 %v3010_v31 }
 0xafb   :  { %2862 = vmatpush3.bf16.msra.mxu0 %v3010_v31 }
 0xafe   :  { %2864 = vmatmul.mubr.msk.bf16.vlgmr.msra.gmra.mxu0 %vm94_vm0, %v1202_v29 }
 0xbae   :  { %v1324_v32 = vpop.f32.mrf.mxu0 }
 0xbaf   :  { %v1392_v0 = vmul.f32 %v1324_v32, %v3435_v57 }
 0xbb0   :  { %v1326_v36 = vpop.f32.mrf.mxu0 }
 0xbb1   :  { %v1396_v30 = vmul.f32 %v3430_v54, %v1326_v36 }
 0xbb2   :  { %v1328_v37 = vpop.f32.mrf.mxu0 }
 0xbb3   :  { %v1393_v33 = vmul.f32 %v1328_v37, %v3440_v58  ;;  %v1400_v40 = vadd.f32 %v1396_v30, %v1392_v0 }
 0xbb4   :  { %v1330_v28 = vpop.f32.mrf.mxu0 }
 0xbb5   :  { %v1397_v39 = vmul.f32 %v3445_v60, %v1330_v28 }
 0xbb6   :  { %v1334_v6 = vpop.f32.mrf.mxu0 }
 0xbb7   :  { %v1401_v41 = vadd.f32 %v1397_v39, %v1393_v33  ;;  %v1394_v45 = vmul.f32 %v1334_v6, %v3468_v16 }
 0xbb8   :  { %v1336_v1 = vpop.f32.mrf.mxu0 }
 0xbb9   :  { %v1404_v2 = vpack.c.bf16 %v1401_v41, %v1400_v40  ;;  %v1398_v44 = vmul.f32 %v3460_v13, %v1336_v1 }
 0xbba   :  { %v1338_v43 = vpop.f32.mrf.mxu0 }
 0xbbb   :  { %1410 = vrot.lane.b32.xlu1 %v1404_v2, %s3300_s14  ;;  %2871 = vmatprep.mubr.msk.bf16.mxu1 %vm346_vm1, %v1404_v2  ;;  %v1395_v57 = vmul.f32 %v1338_v43, %v3473_v17  ;;  %v1402_v46 = vadd.f32 %v1398_v44, %v1394_v45 }
 0xbbc   :  { %v1340_v54 = vpop.f32.mrf.mxu0 }
 0xbbd   :  { %v1399_v58 = vmul.f32 %v3478_v19, %v1340_v54 }
 0xbbe   :  { %v2865_v60 = vpop.f32.mrf.mxu0 }
 0xbbf   :  { %v1403_v48 = vadd.f32 %v1399_v58, %v1395_v57 }
 0xbc0   :  { %v1377_v49 = vpop.f32.mrf.mxu0 }
 0xbc1   :  { %v1405_v50 = vpack.c.bf16 %v1403_v48, %v1402_v46 }
 0xbc2   :  { %v2866_v51 = vpop.f32.mrf.mxu0 }
 0xbc3   :  { %v3711_v52 = vpack.c.bf16 %v2866_v51, %v2865_v60  ;;  %1597 = vrot.lane.b32.xlu1 %v1405_v50, %s3301_s2  ;;  %1412 = vrot.lane.b32.xlu0 %v1405_v50, %s3300_s14 }
 0xbc4   :  { %v1380_v13 = vpop.f32.mrf.mxu0 }
 0xbc5   :  { %v3715_v53 = vpack.c.bf16 %v1380_v13, %v1377_v49  ;;  %2875 = vmatprep.subr.bf16.mxu0 %v3711_v52 }
 0xbc6   :  { %2876 = vmatpush3.bf16.msra.mxu0 %v3711_v52 }
 0xbc7   :  { %1595 = vrot.lane.b32.xlu1 %v1404_v2, %s3301_s2  ;;  %1591 = vrot.lane.b32.xlu0 %v1404_v2, %s3302_s15  ;;  %v3207_v2 = vld [vmem:[#allocation5 + $0x18] sm:$0xff] }
 0xbc8   :  { %2877 = vmatprep.subr.bf16.mxu0 %v3715_v53 }
 0xbca   :  { %2878 = vmatpush3.bf16.msra.mxu0 %v3715_v53 }
 0xbcb   :  { %1593 = vrot.lane.b32.xlu1 %v1405_v50, %s3302_s15 }
 0xc2d   :  { %v1411_v19 = vpop.permute.xlu1 %1410 }
 0xc2e   :  { %v1421_v55 = vsel %vm346_vm1, %v1411_v19, 0 }
 0xc35   :  { %v1413_v16 = vpop.permute.xlu0 %1412  ;;  %v1598_v9 = vpop.permute.xlu1 %1597 }
 0xc36   :  { %v1424_v17 = vsel %vm346_vm1, %v1413_v16, 0  ;;  %2939 = vmatprep.subr.msk.bf16.mxu1 %vm346_vm1, %v1413_v16  ;;  %v1609_v56 = vsel %vm346_vm1, %v1598_v9, 0 }
 0xc37   :  { %2868 = vmatpush3.bf16.xpose.msra.mxu1 %v1424_v17 }
 0xc38   :  { %2940 = vmatprep.subr.msk.bf16.mxu1 %vm346_vm1, %v1411_v19 }
 0xc39   :  { %v1592_v59 = vpop.permute.xlu0 %1591  ;;  %v1596_v63 = vpop.permute.xlu1 %1595 }
 0xc3a   :  { %v1606_v61 = vsel %vm346_vm1, %v1596_v63, 0 }
 0xc3d   :  { %v1594_v62 = vpop.permute.xlu1 %1593 }
 0xc3f   :  { %2870 = vmatpush3.bf16.xpose.msra.mxu1 %v1421_v55 }
 0xc40   :  { %2941 = vmatprep.subr.msk.bf16.mxu1 %vm346_vm1, %v1598_v9 }
 0xc46   :  { %2872 = vmatmul.mubr.msk.bf16.vlgmr.msra.gmra.mxu1 %vm346_vm1, %v1405_v50 }
 0xc47   :  { %2884 = vmatpush3.bf16.xpose.msra.mxu1 %v1609_v56  ;;  %2887 = vmatprep.mubr.msk.bf16.mxu1 %vm346_vm1, %v1592_v59 }
 0xc48   :  { %2942 = vmatprep.subr.msk.bf16.mxu1 %vm346_vm1, %v1596_v63 }
 0xc4f   :  { %2886 = vmatpush3.bf16.xpose.msra.mxu1 %v1606_v61 }
 0xc56   :  { %2888 = vmatmul.mubr.msk.bf16.vlgmr.msra.gmra.mxu1 %vm346_vm1, %v1594_v62 }
 0xd06   :  { %v2873_v3 = vpop.f32.mrf.mxu1 }
 0xd07   :  { %v1477_v5 = vmul.f32 0.17677669, %v2873_v3 }
 0xd08   :  { %v1460_v4 = vpop.f32.mrf.mxu1 }
 0xd09   :  { %v1475_v7 = vmul.f32 0.17677669, %v1460_v4  ;;  %v1481_v20 = vadd.f32 %v1477_v5, %v3508_v47 }
 0xd0a   :  { %v2874_v8 = vpop.f32.mrf.mxu1 }
 0xd0b   :  { %v1479_v10 = vadd.f32 %v1475_v7, %v3499_v35  ;;  %v1478_v12 = vmul.f32 0.17677669, %v2874_v8  ;;  %v1489_v23 = vsel %vm346_vm1, %v1481_v20, -inf }
 0xd0c   :  { %v1463_v11 = vpop.f32.mrf.mxu1 }
 0xd0d   :  { %v1476_v14 = vmul.f32 0.17677669, %v1463_v11  ;;  %v1483_v18 = vsel %vm346_vm1, %v1479_v10, -inf  ;;  %v1482_v25 = vadd.f32 %v1478_v12, %v3501_v38 }
 0xd0e   :  { %1484 = vmax.xlane.f32.xlu0 %v1483_v18 }
 0xd0f   :  { %v1480_v22 = vadd.f32 %v1476_v14, %v3504_v42  ;;  %v1492_v29 = vsel %vm346_vm1, %v1482_v25, -inf }
 0xd11   :  { %v1486_v24 = vsel %vm346_vm1, %v1480_v22, -inf }
 0xd12   :  { %1490 = vmax.xlane.f32.xlu0 %v1489_v23  ;;  %1487 = vmax.xlane.f32.xlu1 %v1486_v24 }
 0xd16   :  { %1493 = vmax.xlane.f32.xlu0 %v1492_v29  ;;  %v2889_v31 = vpop.f32.mrf.mxu1 }
 0xd17   :  { %v1662_v36 = vmul.f32 0.17677669, %v2889_v31 }
 0xd18   :  { %v1645_v32 = vpop.f32.mrf.mxu1 }
 0xd19   :  { %v1660_v37 = vmul.f32 0.17677669, %v1645_v32  ;;  %v1666_v40 = vadd.f32 %v1662_v36, %v3508_v47 }
 0xd1a   :  { %v2890_v30 = vpop.f32.mrf.mxu1 }
 0xd1b   :  { %v1664_v28 = vadd.f32 %v1660_v37, %v3499_v35  ;;  %v1663_v33 = vmul.f32 0.17677669, %v2890_v30  ;;  %v1674_v41 = vsel %vm346_vm1, %v1666_v40, -inf }
 0xd1c   :  { %v1648_v0 = vpop.f32.mrf.mxu1 }
 0xd1d   :  { %v1661_v39 = vmul.f32 0.17677669, %v1648_v0  ;;  %v1668_v6 = vsel %vm346_vm1, %v1664_v28, -inf  ;;  %v1667_v43 = vadd.f32 %v3207_v2, %v1663_v33 }
 0xd1e   :  { %1669 = vmax.xlane.f32.xlu0 %v1668_v6 }
 0xd1f   :  { %v1665_v38 = vadd.f32 %v1661_v39, %v3504_v42  ;;  %v1677_v35 = vsel %vm346_vm1, %v1667_v43, -inf }
 0xd21   :  { %v1671_v1 = vsel %vm346_vm1, %v1665_v38, -inf }
 0xd22   :  { %1675 = vmax.xlane.f32.xlu0 %v1674_v41  ;;  %1672 = vmax.xlane.f32.xlu1 %v1671_v1 }
 0xd26   :  { %1678 = vmax.xlane.f32.xlu1 %v1677_v35 }
 0xd97   :  { %v1485_v44 = vpop.xlane.xlu0 %1484 }
 0xd98   :  { %v1495_v54 = vsub.f32 %v1479_v10, %v1485_v44 }
 0xd9a   :  { %v1499_v47 = vmul.f32 1.442695, %v1495_v54 }
 0xd9b   :  { %v1491_v45 = vpop.xlane.xlu0 %1490  ;;  %v1488_v57 = vpop.xlane.xlu1 %1487 }
 0xd9c   :  { %v1497_v58 = vsub.f32 %v1481_v20, %v1491_v45  ;;  %v1496_v46 = vsub.f32 %v1480_v22, %v1488_v57 }
 0xd9e   :  { %v1503_v60 = vmul.f32 1.442695, %v1497_v58  ;;  %v1501_v49 = vmul.f32 1.442695, %v1496_v46 }
 0xd9f   :  { %v1494_v42 = vpop.xlane.xlu0 %1493 }
 0xda0   :  { %3119 = vpow2.f32 %v1503_v60  ;;  %v1498_v48 = vsub.f32 %v1482_v25, %v1494_v42 }
 0xda1   :  { %3121 = vpow2.f32 %v1499_v47 }
 0xda2   :  { %v1505_v50 = vmul.f32 1.442695, %v1498_v48 }
 0xda4   :  { %3123 = vpow2.f32 %v1505_v50  ;;  %v3011_v50 = vld [vmem:[%s3945_s7 + $0x68] sm:$0xff]  }
 0xda5   :  { %3125 = vpow2.f32 %v1501_v49  ;;  %2907 = vmatprep.subr.bf16.mxu1 %v3011_v50 }
 0xda6   :  { %2908 = vmatpush3.bf16.msra.mxu1 %v3011_v50  ;;  %v2644_v50 = vld [vmem:[%s3942_s4 + $0x3] ss:$0 sm:$0xff] }
 0xda7   :  { %v1670_v51 = vpop.xlane.xlu0 %1669 }
 0xda8   :  { %v1680_v13 = vsub.f32 %v1664_v28, %v1670_v51  ;;  %v3012_v51 = vld [vmem:[%s3945_s7 + $0x60] sm:$0xff]  }
 0xda9   :  { %2909 = vmatprep.subr.bf16.mxu1 %v3012_v51 }
 0xdaa   :  { %v1684_v56 = vmul.f32 1.442695, %v1680_v13  ;;  %2910 = vmatpush3.bf16.msra.mxu1 %v3012_v51  ;;  %v3013_v13 = vld [vmem:[%s3945_s7 + $0x78] sm:$0xff]  }
 0xdab   :  { %v1676_v16 = vpop.xlane.xlu0 %1675  ;;  %v1673_v17 = vpop.xlane.xlu1 %1672 }
 0xdac   :  { %v1682_v19 = vsub.f32 %v1666_v40, %v1676_v16  ;;  %v1681_v63 = vsub.f32 %v1665_v38, %v1673_v17  ;;  %v3014_v16 = vld [vmem:[%s3945_s7 + $0x70] sm:$0xff]  }
 0xdad   :  { %v3120_v55 = vpop.eup %3119 }
 0xdae   :  { %v3122_v9 = vpop.eup %3121  ;;  %v1688_v59 = vmul.f32 1.442695, %v1682_v19  ;;  %v1513_v61 = vsel %vm346_vm1, %v3120_v55, 0.0  ;;  %v1686_v7 = vmul.f32 1.442695, %v1681_v63 }
 0xdaf   :  { %1514 = vadd.xlane.f32.xlu0 %v1513_v61  ;;  %v1679_v62 = vpop.xlane.xlu1 %1678  ;;  %v1507_v5 = vsel %vm346_vm1, %v3122_v9, 0.0 }
 0xdb0   :  { %3127 = vpow2.f32 %v1688_v59  ;;  %v1683_v3 = vsub.f32 %v1667_v43, %v1679_v62 }
 0xdb1   :  { %v3124_v4 = vpop.eup %3123  ;;  %3129 = vpow2.f32 %v1684_v56 }
 0xdb2   :  { %v1690_v8 = vmul.f32 1.442695, %v1683_v3  ;;  %v1516_v10 = vsel %vm346_vm1, %v3124_v4, 0.0  ;;  %v3126_v11 = vpop.eup %3125 }
 0xdb3   :  { %1508 = vadd.xlane.f32.xlu0 %v1507_v5  ;;  %1517 = vadd.xlane.f32.xlu1 %v1516_v10  ;;  %v1510_v12 = vsel %vm346_vm1, %v3126_v11, 0.0 }
 0xdb4   :  { %3131 = vpow2.f32 %v1690_v8 }
 0xdb5   :  { %3133 = vpow2.f32 %v1686_v7 }
 0xdb7   :  { %1511 = vadd.xlane.f32.xlu1 %v1510_v12 }
 0xdbd   :  { %v3128_v14 = vpop.eup %3127 }
 0xdbe   :  { %v1698_v18 = vsel %vm346_vm1, %v3128_v14, 0.0  ;;  %v3130_v20 = vpop.eup %3129 }
 0xdbf   :  { %1699 = vadd.xlane.f32.xlu0 %v1698_v18  ;;  %v1692_v23 = vsel %vm346_vm1, %v3130_v20, 0.0 }
 0xdc1   :  { %v3132_v22 = vpop.eup %3131 }
 0xdc2   :  { %v1701_v24 = vsel %vm346_vm1, %v3132_v22, 0.0  ;;  %v3134_v25 = vpop.eup %3133 }
 0xdc3   :  { %1693 = vadd.xlane.f32.xlu0 %v1692_v23  ;;  %1702 = vadd.xlane.f32.xlu1 %v1701_v24  ;;  %v1695_v29 = vsel %vm346_vm1, %v3134_v25, 0.0 }
 0xdc7   :  { %1696 = vadd.xlane.f32.xlu1 %v1695_v29 }
 0xdd8   :  { %1716 = vrot.lane.b32.xlu1 %v3715_v53, %s3302_s15 }
 0xdd9   :  { %1718 = vrot.lane.b32.xlu0 %v3711_v52, %s3302_s15 }
 0xe38   :  { %v1515_v31 = vpop.xlane.xlu0 %1514 }
 0xe3c   :  { %v1509_v32 = vpop.xlane.xlu0 %1508  ;;  %v1518_v36 = vpop.xlane.xlu1 %1517 }
 0xe3d   :  { %3135 = vrcp.f32 %v1518_v36 }
 0xe3e   :  { %3137 = vrcp.f32 %v1509_v32 }
 0xe3f   :  { %3139 = vrcp.f32 %v1515_v31 }
 0xe40   :  { %v1512_v37 = vpop.xlane.xlu1 %1511 }
 0xe41   :  { %3141 = vrcp.f32 %v1512_v37 }
 0xe48   :  { %v1700_v30 = vpop.xlane.xlu0 %1699 }
 0xe4a   :  { %v3136_v28 = vpop.eup %3135 }
 0xe4b   :  { %v3138_v0 = vpop.eup %3137  ;;  %v1526_v53 = vmul.f32 %v3136_v28, %v3124_v4 }
 0xe4c   :  { %v1694_v33 = vpop.xlane.xlu0 %1693  ;;  %v1703_v39 = vpop.xlane.xlu1 %1702  ;;  %v1523_v38 = vmul.f32 %v3138_v0, %v3122_v9 }
 0xe4d   :  { %v3140_v6 = vpop.eup %3139  ;;  %3143 = vrcp.f32 %v1703_v39  ;;  %v3015_v39 = vld [vmem:[#allocation7 + $0x70] ss:$8 sps:$4 sm:$0xff]  }
 0xe4e   :  { %v3142_v40 = vpop.eup %3141  ;;  %3145 = vrcp.f32 %v1694_v33  ;;  %v1525_v2 = vmul.f32 %v3140_v6, %v3120_v55  ;;  %v3017_v33 = vld [vmem:[#allocation7 + $0x74] ss:$8 sps:$4 sm:$0xff]   ;;  %v3020_v6 = vld [vmem:[#allocation7 + $0x64] ss:$8 sps:$4 sm:$0xff]  }
 0xe4f   :  { %v1524_v52 = vmul.f32 %v3142_v40, %v3126_v11  ;;  %3147 = vrcp.f32 %v1700_v30  ;;  %v3018_v40 = vld [vmem:[#allocation7 + $0x60] ss:$8 sps:$4 sm:$0xff]  }
 0xe50   :  { %v1719_v41 = vpop.permute.xlu0 %1718  ;;  %v1697_v1 = vpop.xlane.xlu1 %1696  ;;  %v1528_v35 = vpack.c.bf16 %v1526_v53, %v1525_v2  ;;  %v3023_v53 = vld [vmem:[#allocation7 + $0x54] ss:$8 sps:$4 sm:$0xff]  }
 0xe51   :  { %3149 = vrcp.f32 %v1697_v1  ;;  %2891 = vmatprep.subr.bf16.mxu0 %v1719_v41  ;;  %v1527_v43 = vpack.c.bf16 %v1524_v52, %v1523_v38  ;;  %v3021_v38 = vld [vmem:[#allocation7 + $0x50] ss:$8 sps:$4 sm:$0xff]   ;;  %v3024_v52 = vld [vmem:[#allocation7 + $0x40] ss:$8 sps:$4 sm:$0xff]  }
 0xe53   :  { %2879 = vmatprep.mubr.msk.bf16.mxu0 %vm346_vm1, %v1527_v43 }
 0xe54   :  { %2880 = vmatmul.mubr.msk.bf16.vlgmr.msra.gmra.mxu0 %vm346_vm1, %v1528_v35  ;;  %v1717_v44 = vpop.permute.xlu1 %1716 }
 0xe55   :  { %2892 = vmatpush3.bf16.msra.mxu0 %v1719_v41  ;;  %v3026_v41 = vld [vmem:[#allocation7 + $0x44] ss:$8 sps:$4 sm:$0xff]  }
 0xe56   :  { %2893 = vmatprep.subr.bf16.mxu0 %v1717_v44 }
 0xe59   :  { %2894 = vmatpush3.bf16.msra.mxu0 %v1717_v44 }
 0xe5a   :  { %v3144_v54 = vpop.eup %3143  ;;  %2899 = vmatprep.subr.bf16.mxu0 %v3013_v13 }
 0xe5b   :  { %v3146_v45 = vpop.eup %3145  ;;  %v1711_v47 = vmul.f32 %v3144_v54, %v3132_v22 }
 0xe5c   :  { %v3148_v57 = vpop.eup %3147  ;;  %v1708_v60 = vmul.f32 %v3146_v45, %v3130_v20 }
 0xe5d   :  { %v1710_v42 = vmul.f32 %v3148_v57, %v3128_v14 }
 0xe5e   :  { %v3150_v58 = vpop.eup %3149 }
 0xe5f   :  { %v1709_v46 = vmul.f32 %v3150_v58, %v3134_v25  ;;  %v1713_v49 = vpack.c.bf16 %v1711_v47, %v1710_v42 }
 0xe61   :  { %v1712_v48 = vpack.c.bf16 %v1709_v46, %v1708_v60 }
 0xe63   :  { %2895 = vmatprep.mubr.msk.bf16.mxu0 %vm346_vm1, %v1712_v48 }
 0xe64   :  { %2896 = vmatmul.mubr.msk.bf16.vlgmr.msra.gmra.mxu0 %vm346_vm1, %v1713_v49 }
 0xe65   :  { %2900 = vmatpush3.bf16.msra.mxu0 %v3013_v13 }
 0xe66   :  { %2901 = vmatprep.subr.bf16.mxu0 %v3014_v16 }
 0xe69   :  { %2902 = vmatpush3.bf16.msra.mxu0 %v3014_v16 }
 0xe6a   :  { %2030 = vmatprep.subr.bf16.mxu0 %v3017_v33 }
 0xf14   :  { %v2881_v17 = vpop.f32.mrf.mxu0 }
 0xf16   :  { %v1569_v19 = vpop.f32.mrf.mxu0 }
 0xf18   :  { %v2882_v55 = vpop.f32.mrf.mxu0 }
 0xf19   :  { %v1585_v59 = vpack.c.bf16 %v2882_v55, %v2881_v17 }
 0xf1a   :  { %v1572_v9 = vpop.f32.mrf.mxu0 }
 0xf1b   :  { %v1584_v56 = vpack.c.bf16 %v1572_v9, %v1569_v19 }
 0xf1d   :  { %2911 = vmatprep.mubr.msk.bf16.mxu1 %vm346_vm1, %v1584_v56 }
 0xf1e   :  { %2912 = vmatmul.mubr.msk.bf16.vlgmr.msra.gmra.mxu1 %vm346_vm1, %v1585_v59 }
 0xf24   :  { %v2897_v63 = vpop.f32.mrf.mxu0 }
 0xf26   :  { %v1762_v61 = vpop.f32.mrf.mxu0 }
 0xf28   :  { %v2898_v62 = vpop.f32.mrf.mxu0 }
 0xf29   :  { %v1778_v5 = vpack.c.bf16 %v2898_v62, %v2897_v63  ;;  %v3027_v62 = vld [vmem:[%s3945_s7 + $0xb8] sm:$0xff]  }
 0xf2a   :  { %v1765_v3 = vpop.f32.mrf.mxu0  ;;  %2915 = vmatprep.subr.bf16.mxu1 %v3027_v62 }
 0xf2b   :  { %v1777_v4 = vpack.c.bf16 %v1765_v3, %v1762_v61  ;;  %2916 = vmatpush3.bf16.msra.mxu1 %v3027_v62  ;;  %v3028_v3 = vld [vmem:[%s3945_s7 + $0xb0] sm:$0xff]  }
 0xf2c   :  { %2917 = vmatprep.subr.bf16.mxu1 %v3028_v3  ;;  %v3041_v62 = vld [vmem:[#allocation7 + $0x90] ss:$8 sps:$4 sm:$0xff]  }
 0xf2d   :  { %2903 = vmatprep.mubr.msk.bf16.mxu0 %vm346_vm1, %v1777_v4  ;;  %v3029_v4 = vld [vmem:[%s3945_s7 + $0xa8] sm:$0xff]  }
 0xf2e   :  { %2904 = vmatmul.mubr.msk.bf16.vlgmr.msra.gmra.mxu0 %vm346_vm1, %v1778_v5  ;;  %v3030_v5 = vld [vmem:[%s3945_s7 + $0xa0] sm:$0xff]  }
 0xf2f   :  { %2054 = vmatprep.mubr.bf16.mxu0 %v3299_v21  ;;  %2031 = vmatpush1.bf16.msra.mxu0 %v3015_v39 }
 0xf30   :  { %2032 = vmatprep.subr.bf16.mxu0 %v3020_v6  ;;  %2918 = vmatpush3.bf16.msra.mxu1 %v3028_v3  ;;  %v3046_v3 = vld [vmem:[#allocation7 + $0x84] ss:$8 sps:$4 sm:$0xff]  }
 0xf31   :  { %2919 = vmatprep.subr.bf16.mxu1 %v3029_v4 }
 0xf33   :  { %2033 = vmatpush1.bf16.msra.mxu0 %v3018_v40 }
 0xf34   :  { %2034 = vmatprep.subr.bf16.mxu0 %v3023_v53  ;;  %2920 = vmatpush3.bf16.msra.mxu1 %v3029_v4  ;;  %v3044_v4 = vld [vmem:[#allocation7 + $0x80] ss:$8 sps:$4 sm:$0xff]  }
 0xf35   :  { %2921 = vmatprep.subr.bf16.mxu1 %v3030_v5 }
 0xf37   :  { %2035 = vmatpush1.bf16.msra.mxu0 %v3021_v38 }
 0xf38   :  { %2036 = vmatprep.subr.bf16.mxu0 %v3026_v41  ;;  %2922 = vmatpush3.bf16.msra.mxu1 %v3030_v5 }
 0xf3b   :  { %2037 = vmatpush1.bf16.msra.mxu0 %v3024_v52 }
 0xfde   :  { %v2913_v7 = vpop.f32.mrf.mxu1 }
 0xfe0   :  { %v1902_v8 = vpop.f32.mrf.mxu1 }
 0xfe2   :  { %v2914_v11 = vpop.f32.mrf.mxu1 }
 0xfe4   :  { %v1905_v24 = vpop.f32.mrf.mxu1 }
 0xfee   :  { %v2905_v10 = vpop.f32.mrf.mxu0 }
 0xfef   :  { %v1911_v20 = vadd.f32 %v2913_v7, %v2905_v10  ;;  %v3031_v7 = vld [vmem:[%s3945_s7 + $0x98] sm:$0xff]   ;;  %v3033_v10 = vld [vmem:[%s3945_s7 + $0x88] sm:$0xff]  }
 0xff0   :  { %v1835_v12 = vpop.f32.mrf.mxu0  ;;  %2923 = vmatprep.subr.bf16.mxu1 %v3031_v7 }
 0xff1   :  { %v1903_v14 = vadd.f32 %v1902_v8, %v1835_v12  ;;  %v3792_v36 = vadd.f32 %v1911_v20, %v3630_v26  ;;  %2924 = vmatpush3.bf16.msra.mxu1 %v3031_v7  ;;  %v3032_v8 = vld [vmem:[%s3945_s7 + $0x90] sm:$0xff]  }
 0xff2   :  { %v2906_v18 = vpop.f32.mrf.mxu0  ;;  %2925 = vmatprep.subr.bf16.mxu1 %v3032_v8 }
 0xff3   :  { %v3784_v22 = vadd.f32 %v1903_v14, %v3633_v27  ;;  %v1914_v23 = vadd.f32 %v2914_v11, %v2906_v18  ;;  %v1925_v26 = vmul.f32 %v3792_v36, %v3792_v36  ;;  %v3034_v11 = vld [vmem:[%s3945_s7 + $0x80] sm:$0xff]  }
 0xff4   :  { %v1838_v25 = vpop.f32.mrf.mxu0 }
 0xff5   :  { %v3787_v29 = vadd.f32 %v1914_v23, %v3638_v15  ;;  %v1906_v31 = vadd.f32 %v1905_v24, %v1838_v25  ;;  %v1923_v32 = vmul.f32 %v3784_v22, %v3784_v22  ;;  %2926 = vmatpush3.bf16.msra.mxu1 %v3032_v8 }
 0xff6   :  { %2927 = vmatprep.subr.bf16.mxu1 %v3033_v10 }
 0xff7   :  { %v3795_v37 = vadd.f32 %v1906_v31, %v3641_v34  ;;  %v1927_v30 = vsel %vm94_vm0, %v1923_v32, 0.0  ;;  %v1926_v27 = vmul.f32 %v3787_v29, %v3787_v29  ;;  %v1933_v34 = vsel %vm94_vm0, %v1925_v26, 0.0 }
 0xff8   :  { %1928 = vadd.xlane.f32.xlu1 %v1927_v30 }
 0xff9   :  { %v1924_v15 = vmul.f32 %v3795_v37, %v3795_v37  ;;  %v1936_v28 = vsel %vm94_vm0, %v1926_v27, 0.0  ;;  %2928 = vmatpush3.bf16.msra.mxu1 %v3033_v10 }
 0xffa   :  { %2929 = vmatprep.subr.bf16.mxu1 %v3034_v11 }
 0xffb   :  { %v1930_v0 = vsel %vm94_vm0, %v1924_v15, 0.0 }
 0xffc   :  { %1937 = vadd.xlane.f32.xlu1 %v1936_v28  ;;  %1931 = vadd.xlane.f32.xlu0 %v1930_v0 }
 0xffd   :  { %2930 = vmatpush3.bf16.msra.mxu1 %v3034_v11 }
0x1000   :  { %1934 = vadd.xlane.f32.xlu0 %v1933_v34 }
0x1081   :  { %v1929_v1 = vpop.xlane.xlu1 %1928 }
0x1082   :  { %v1939_v2 = vmul.f32 0.015625, %v1929_v1 }
0x1084   :  { %v1943_v43 = vadd.f32 1e-06, %v1939_v2 }
0x1085   :  { %v1938_v35 = vpop.xlane.xlu1 %1937  ;;  %v1932_v44 = vpop.xlane.xlu0 %1931 }
0x1086   :  { %v1940_v54 = vmul.f32 0.015625, %v1932_v44  ;;  %3151 = vrsqrt.f32 %v1943_v43  ;;  %v1942_v45 = vmul.f32 0.015625, %v1938_v35 }
0x1088   :  { %v1944_v57 = vadd.f32 1e-06, %v1940_v54  ;;  %v1946_v60 = vadd.f32 1e-06, %v1942_v45 }
0x1089   :  { %v1935_v58 = vpop.xlane.xlu0 %1934 }
0x108a   :  { %v1941_v47 = vmul.f32 0.015625, %v1935_v58  ;;  %3153 = vrsqrt.f32 %v1944_v57 }
0x108c   :  { %v1945_v46 = vadd.f32 1e-06, %v1941_v47 }
0x108e   :  { %3155 = vrsqrt.f32 %v1945_v46 }
0x108f   :  { %3157 = vrsqrt.f32 %v1946_v60 }
0x1093   :  { %v3152_v42 = vpop.eup %3151 }
0x1094   :  { %v1951_v48 = vmul.f32 %v3152_v42, %v3784_v22 }
0x1096   :  { %v1961_v16 = vmul.f32 %v2644_v50, %v1951_v48 }
0x1097   :  { %v3154_v49 = vpop.eup %3153 }
0x1098   :  { %v1952_v51 = vmul.f32 %v3154_v49, %v3795_v37 }
0x109a   :  { %v1962_v17 = vmul.f32 %v2644_v50, %v1952_v51 }
0x109b   :  { %v3156_v13 = vpop.eup %3155 }
0x109c   :  { %v3158_v19 = vpop.eup %3157  ;;  %v1965_v55 = vpack.c.bf16 %v1962_v17, %v1961_v16  ;;  %v1953_v9 = vmul.f32 %v3156_v13, %v3792_v36 }
0x109d   :  { %v1954_v56 = vmul.f32 %v3158_v19, %v3787_v29 }
0x109e   :  { %2653 = vmatmul.mubr.msk.bf16.vlgmr.msra.gmra.mxu0 %vm94_vm0, %v1965_v55  ;;  %v1963_v59 = vmul.f32 %v2644_v50, %v1953_v9 }
0x109f   :  { %2064 = vmatprep.mubr.bf16.mxu0 %v3299_v21  ;;  %v1964_v63 = vmul.f32 %v2644_v50, %v1954_v56 }
0x10a1   :  { %v1966_v61 = vpack.c.bf16 %v1964_v63, %v1963_v59  ;;  %v3035_v63 = vld [vmem:[#allocation7 + $0xb0] ss:$8 sps:$4 sm:$0xff]  }
0x10a6   :  { %2654 = vmatmul.mubr.msk.bf16.gmra.mxu0 %vm94_vm0, %v1966_v61  ;;  %v3043_v61 = vld [vmem:[#allocation7 + $0x94] ss:$8 sps:$4 sm:$0xff]  }
0x10a7   :  { %2359 = vmatprep.mubr.bf16.mxu0 %v3299_v21 }
0x115e   :  { %v2056_v12 = vpop.f32.mrf.mxu0 }
0x115f   :  { %v2655_v14 = vmul.f32 -1.442695, %v2056_v12 }
0x1160   :  { %v2058_v18 = vpop.f32.mrf.mxu0 }
0x1161   :  { %3159 = vpow2.f32 %v2655_v14 }
0x1162   :  { %v2060_v20 = vpop.f32.mrf.mxu0 }
0x1163   :  { %v2656_v23 = vmul.f32 -1.442695, %v2060_v20 }
0x1164   :  { %v2062_v24 = vpop.f32.mrf.mxu0 }
0x1165   :  { %3161 = vpow2.f32 %v2656_v23 }
0x1166   :  { %v2066_v25 = vpop.f32.mrf.mxu0 }
0x1167   :  { %v2657_v31 = vmul.f32 -1.442695, %v2066_v25 }
0x1168   :  { %v2068_v32 = vpop.f32.mrf.mxu0 }
0x1169   :  { %3163 = vpow2.f32 %v2657_v31 }
0x116a   :  { %v2070_v30 = vpop.f32.mrf.mxu0 }
0x116b   :  { %v2658_v27 = vmul.f32 -1.442695, %v2070_v30 }
0x116c   :  { %v2072_v45 = vpop.f32.mrf.mxu0 }
0x116d   :  { %3165 = vpow2.f32 %v2658_v27  ;;  %v2684_v27 = vld [vmem:[%s3942_s4 + $0x4] ss:$0 sm:$0xff] }
0x116e   :  { %v3160_v15 = vpop.eup %3159 }
0x116f   :  { %v2087_v28 = vadd.f32 1.0, %v3160_v15 }
0x1171   :  { %3167 = vrcp.f32 %v2087_v28 }
0x1172   :  { %v3162_v0 = vpop.eup %3161 }
0x1173   :  { %v2088_v26 = vadd.f32 1.0, %v3162_v0 }
0x1175   :  { %3169 = vrcp.f32 %v2088_v26 }
0x1176   :  { %v3164_v34 = vpop.eup %3163 }
0x1177   :  { %v2089_v33 = vadd.f32 1.0, %v3164_v34 }
0x1179   :  { %3171 = vrcp.f32 %v2089_v33 }
0x117a   :  { %v3166_v39 = vpop.eup %3165 }
0x117b   :  { %v2090_v6 = vadd.f32 1.0, %v3166_v39 }
0x117d   :  { %3173 = vrcp.f32 %v2090_v6 }
0x117e   :  { %v3168_v40 = vpop.eup %3167 }
0x117f   :  { %v2099_v53 = vmul.f32 %v3168_v40, %v2056_v12 }
0x1181   :  { %v2103_v41 = vmul.f32 %v2099_v53, %v2058_v18 }
0x1182   :  { %v3170_v38 = vpop.eup %3169 }
0x1183   :  { %v2100_v52 = vmul.f32 %v3170_v38, %v2060_v20 }
0x1185   :  { %v2104_v1 = vmul.f32 %v2100_v52, %v2062_v24 }
0x1186   :  { %v3172_v2 = vpop.eup %3171 }
0x1187   :  { %v2107_v43 = vpack.c.bf16 %v2104_v1, %v2103_v41  ;;  %v2101_v35 = vmul.f32 %v3172_v2, %v2066_v25 }
0x1189   :  { %2931 = vmatprep.mubr.bf16.mxu1 %v2107_v43  ;;  %v2105_v57 = vmul.f32 %v2101_v35, %v2068_v32 }
0x118a   :  { %v3174_v44 = vpop.eup %3173 }
0x118b   :  { %v2102_v54 = vmul.f32 %v3174_v44, %v2070_v30 }
0x118d   :  { %v2106_v58 = vmul.f32 %v2102_v54, %v2072_v45 }
0x118f   :  { %v2108_v47 = vpack.c.bf16 %v2106_v58, %v2105_v57 }
0x1191   :  { %2932 = vmatmul.mubr.bf16.vlgmr.msra.gmra.mxu1 %v2108_v47 }
0x1251   :  { %v2933_v60 = vpop.f32.mrf.mxu1 }
0x1252   :  { %v2224_v42 = vadd.f32 %v2933_v60, %v3792_v36  ;;  %v3037_v36 = vld [vmem:[#allocation7 + $0xb4] ss:$8 sps:$4 sm:$0xff]  }
0x1253   :  { %v2207_v46 = vpop.f32.mrf.mxu1  ;;  %2335 = vmatprep.subr.bf16.mxu0 %v3037_v36 }
0x1254   :  { %v2222_v48 = vadd.f32 %v2207_v46, %v3784_v22  ;;  %v2230_v19 = vmul.f32 %v2224_v42, %v2224_v42  ;;  %2336 = vmatpush1.bf16.msra.mxu0 %v3035_v63 }
0x1255   :  { %v2934_v49 = vpop.f32.mrf.mxu1 }
0x1256   :  { %v2228_v50 = vmul.f32 %v2222_v48, %v2222_v48  ;;  %v2225_v13 = vadd.f32 %v2934_v49, %v3787_v29  ;;  %v2238_v9 = vsel %vm94_vm0, %v2230_v19, 0.0  ;;  %v3040_v29 = vld [vmem:[#allocation7 + $0xa4] ss:$8 sps:$4 sm:$0xff]  }
0x1257   :  { %v2210_v51 = vpop.f32.mrf.mxu1  ;;  %2337 = vmatprep.subr.bf16.mxu0 %v3040_v29 }
0x1258   :  { %v2223_v16 = vadd.f32 %v2210_v51, %v3795_v37  ;;  %v2232_v17 = vsel %vm94_vm0, %v2228_v50, 0.0  ;;  %v2231_v59 = vmul.f32 %v2225_v13, %v2225_v13  ;;  %v3038_v37 = vld [vmem:[#allocation7 + $0xa0] ss:$8 sps:$4 sm:$0xff]  }
0x1259   :  { %2233 = vadd.xlane.f32.xlu0 %v2232_v17  ;;  %2338 = vmatpush1.bf16.msra.mxu0 %v3038_v37 }
0x125a   :  { %v2229_v55 = vmul.f32 %v2223_v16, %v2223_v16  ;;  %v2241_v22 = vsel %vm94_vm0, %v2231_v59, 0.0  ;;  %2339 = vmatprep.subr.bf16.mxu0 %v3043_v61 }
0x125c   :  { %v2235_v56 = vsel %vm94_vm0, %v2229_v55, 0.0 }
0x125d   :  { %2239 = vadd.xlane.f32.xlu0 %v2238_v9  ;;  %2236 = vadd.xlane.f32.xlu1 %v2235_v56 }
0x125e   :  { %2340 = vmatpush1.bf16.msra.mxu0 %v3041_v62 }
0x125f   :  { %2341 = vmatprep.subr.bf16.mxu0 %v3046_v3 }
0x1261   :  { %2242 = vadd.xlane.f32.xlu1 %v2241_v22 }
0x1262   :  { %2342 = vmatpush1.bf16.msra.mxu0 %v3044_v4 }
0x12e2   :  { %v2234_v5 = vpop.xlane.xlu0 %2233 }
0x12e3   :  { %v2244_v7 = vmul.f32 0.015625, %v2234_v5 }
0x12e5   :  { %v2248_v8 = vadd.f32 1e-06, %v2244_v7 }
0x12e6   :  { %v2240_v10 = vpop.xlane.xlu0 %2239  ;;  %v2237_v11 = vpop.xlane.xlu1 %2236 }
0x12e7   :  { %v2245_v12 = vmul.f32 0.015625, %v2237_v11  ;;  %3175 = vrsqrt.f32 %v2248_v8  ;;  %v2246_v14 = vmul.f32 0.015625, %v2240_v10  ;;  %v2440_v11 = vld [vmem:[%s3941_s3] sm:$0xff] }
0x12e9   :  { %v2249_v18 = vadd.f32 1e-06, %v2245_v12  ;;  %v2250_v24 = vadd.f32 1e-06, %v2246_v14  ;;  %v2441_v12 = vld [vmem:[%s3941_s3 + $0x8] sm:$0xff] }
0x12ea   :  { %v2243_v20 = vpop.xlane.xlu1 %2242 }
0x12eb   :  { %v2247_v23 = vmul.f32 0.015625, %v2243_v20  ;;  %3177 = vrsqrt.f32 %v2249_v18  ;;  %v2468_v18 = vadd.f32 %v2441_v12, %v2440_v11 }
0x12ed   :  { %v2251_v25 = vadd.f32 1e-06, %v2247_v23 }
0x12ef   :  { %3179 = vrsqrt.f32 %v2251_v25  ;;  %v2442_v25 = vld [vmem:[%s3941_s3 + $0x10] sm:$0xff] }
0x12f0   :  { %3181 = vrsqrt.f32 %v2250_v24 }
0x12f4   :  { %v3176_v31 = vpop.eup %3175 }
0x12f5   :  { %v2256_v32 = vmul.f32 %v3176_v31, %v2222_v48  ;;  %v2443_v31 = vld [vmem:[%s3941_s3 + $0x18] sm:$0xff] }
0x12f7   :  { %v2266_v0 = vmul.f32 %v2684_v27, %v2256_v32 }
0x12f8   :  { %v3178_v30 = vpop.eup %3177 }
0x12f9   :  { %v2257_v15 = vmul.f32 %v3178_v30, %v2223_v16  ;;  %v2471_v30 = vadd.f32 %v2443_v31, %v2442_v25 }
0x12fb   :  { %v2267_v26 = vmul.f32 %v2684_v27, %v2257_v15 }
0x12fc   :  { %v3180_v28 = vpop.eup %3179 }
0x12fd   :  { %v3182_v34 = vpop.eup %3181  ;;  %v2270_v33 = vpack.c.bf16 %v2267_v26, %v2266_v0  ;;  %v2259_v39 = vmul.f32 %v3180_v28, %v2225_v13  ;;  %v2444_v28 = vld [vmem:[%s3941_s3 + $0x20] sm:$0xff]  ;;  %v2445_v0 = vld [vmem:[%s3941_s3 + $0x28] sm:$0xff] }
0x12fe   :  { %v2258_v6 = vmul.f32 %v3182_v34, %v2224_v42  ;;  %v2474_v34 = vadd.f32 %v2445_v0, %v2444_v28 }
0x12ff   :  { %2693 = vmatmul.mubr.msk.bf16.vlgmr.msra.gmra.mxu0 %vm94_vm0, %v2270_v33  ;;  %v2269_v40 = vmul.f32 %v2684_v27, %v2259_v39 }
0x1300   :  { %2369 = vmatprep.mubr.bf16.mxu0 %v3299_v21  ;;  %v2268_v53 = vmul.f32 %v2684_v27, %v2258_v6  ;;  %v2447_v6 = vld [vmem:[%s3941_s3 + $0x38] sm:$0xff] }
0x1302   :  { %v2271_v38 = vpack.c.bf16 %v2269_v40, %v2268_v53  ;;  %v2446_v40 = vld [vmem:[%s3941_s3 + $0x30] sm:$0xff]  ;;  %s3303_s3 = smov [#allocation8]  }
0x1303   :  { %s2514_s30 = sshll.u32 %s3303_s3, 4  ;;  %s2515_s30 = int_to_ptr.vmem [resolvable:$true] %s2514_s30 }
0x1304   :  { %s3268_s10 = scalar_lea.vmem %s2515_s30, 16  ;;  %s3272_s11 = scalar_lea.vmem %s2515_s30, 32 }
0x1305   :  { %p3269_p1 = scmp.ne.s32.totalorder %s2515_s30, %s3268_s10  ;;  %p3273_p2 = scmp.lt.s32.totalorder %s2515_s30, %s2515_s30 }
0x1306   :  { %p3274_p3 = scmp.lt.s32.totalorder %s3272_s11, %s3268_s10 }
0x1307   :  { %2694 = vmatmul.mubr.msk.bf16.gmra.mxu0 %vm94_vm0, %v2271_v38  ;;  %v2477_v38 = vadd.f32 %v2447_v6, %v2446_v40 }
0x1308   :  { %p3275_p4 = por %p3274_p3, %p3273_p2 }
0x130a   :  { %p3276_p5 = pnand %p3275_p4, %p3269_p1 }
0x13bf   :  { %v3856_v52 = vpop.f32.mrf.mxu0 }
0x13c0   :  { %v2448_v32 = vmul.f32 %v2440_v11, %v3856_v52 }
0x13c1   :  { %v2363_v41 = vpop.f32.mrf.mxu0 }
0x13c2   :  { %v2380_v1 = vmax.f32 %v3856_v52, %v2363_v41  ;;  %v2449_v24 = vmul.f32 %v2441_v12, %v2363_v41 }
0x13c3   :  { %v3859_v2 = vpop.f32.mrf.mxu0 }
0x13c4   :  { %2381 = vmax.xlane.f32.xlu0 %v2380_v1  ;;  %v2456_v27 = vadd.f32 %v2449_v24, %v2448_v32  ;;  %v2450_v26 = vmul.f32 %v2442_v25, %v3859_v2 }
0x13c5   :  { %v3861_v43 = vpop.f32.mrf.mxu0 }
0x13c6   :  { %v2383_v35 = vmax.f32 %v3859_v2, %v3861_v43  ;;  %v2451_v15 = vmul.f32 %v2443_v31, %v3861_v43 }
0x13c7   :  { %v3865_v44 = vpop.f32.mrf.mxu0 }
0x13c8   :  { %2384 = vmax.xlane.f32.xlu1 %v2383_v35  ;;  %v2459_v33 = vadd.f32 %v2451_v15, %v2450_v26  ;;  %v2452_v53 = vmul.f32 %v2444_v28, %v3865_v44 }
0x13c9   :  { %v3867_v21 = vpop.f32.mrf.mxu0 }
0x13ca   :  { %v2386_v54 = vmax.f32 %v3865_v44, %v3867_v21  ;;  %v2453_v39 = vmul.f32 %v2445_v0, %v3867_v21 }
0x13cb   :  { %v3871_v45 = vpop.f32.mrf.mxu0 }
0x13cc   :  { %2387 = vmax.xlane.f32.xlu0 %v2386_v54  ;;  %v2454_v1 = vmul.f32 %v2446_v40, %v3871_v45 }
0x13cd   :  { %v3873_v57 = vpop.f32.mrf.mxu0 }
0x13ce   :  { %v2389_v58 = vmax.f32 %v3871_v45, %v3873_v57 }
0x13d0   :  { %2390 = vmax.xlane.f32.xlu1 %v2389_v58 }
0x144d   :  { %v3877_v47 = vpop.xlane.xlu0 %2381 }
0x144e   :  { %v2392_v60 = vsub.f32 %v3856_v52, %v3877_v47  ;;  %v2393_v46 = vsub.f32 %v2363_v41, %v3877_v47  ;;  %v2455_v52 = vmul.f32 %v2447_v6, %v3873_v57  ;;  %v2462_v41 = vadd.f32 %v2453_v39, %v2452_v53 }
0x1450   :  { %v2400_v42 = vmul.f32 1.442695, %v2392_v60  ;;  %v2402_v48 = vmul.f32 1.442695, %v2393_v46 }
0x1451   :  { %v3882_v49 = vpop.xlane.xlu1 %2384 }
0x1452   :  { %3183 = vpow2.f32 %v2400_v42  ;;  %v2394_v50 = vsub.f32 %v3859_v2, %v3882_v49  ;;  %v2395_v51 = vsub.f32 %v3861_v43, %v3882_v49  ;;  %v2465_v2 = vadd.f32 %v2455_v52, %v2454_v1 }
0x1453   :  { %3185 = vpow2.f32 %v2402_v48 }
0x1454   :  { %v2404_v13 = vmul.f32 1.442695, %v2394_v50  ;;  %v2406_v16 = vmul.f32 1.442695, %v2395_v51 }
0x1455   :  { %v3888_v17 = vpop.xlane.xlu0 %2387 }
0x1456   :  { %3187 = vpow2.f32 %v2404_v13  ;;  %v2396_v19 = vsub.f32 %v3865_v44, %v3888_v17  ;;  %v2397_v55 = vsub.f32 %v3867_v21, %v3888_v17 }
0x1457   :  { %3189 = vpow2.f32 %v2406_v16 }
0x1458   :  { %v2408_v9 = vmul.f32 1.442695, %v2396_v19  ;;  %v2410_v56 = vmul.f32 1.442695, %v2397_v55 }
0x1459   :  { %v3894_v59 = vpop.xlane.xlu1 %2390 }
0x145a   :  { %3191 = vpow2.f32 %v2408_v9  ;;  %v2398_v22 = vsub.f32 %v3871_v45, %v3894_v59  ;;  %v2399_v36 = vsub.f32 %v3873_v57, %v3894_v59 }
0x145b   :  { %3193 = vpow2.f32 %v2410_v56 }
0x145c   :  { %v2412_v63 = vmul.f32 1.442695, %v2398_v22  ;;  %v2414_v29 = vmul.f32 1.442695, %v2399_v36 }
0x145e   :  { %3195 = vpow2.f32 %v2412_v63 }
0x145f   :  { %v3184_v37 = vpop.eup %3183  ;;  %3197 = vpow2.f32 %v2414_v29 }
0x1460   :  { %v3186_v61 = vpop.eup %3185 }
0x1461   :  { %v2416_v62 = vadd.f32 %v3186_v61, %v3184_v37 }
0x1463   :  { %v3188_v3 = vpop.eup %3187  ;;  %2417 = vadd.xlane.f32.xlu0 %v2416_v62 }
0x1464   :  { %v3190_v4 = vpop.eup %3189 }
0x1465   :  { %v2419_v5 = vadd.f32 %v3190_v4, %v3188_v3 }
0x1467   :  { %v3192_v7 = vpop.eup %3191  ;;  %2420 = vadd.xlane.f32.xlu1 %v2419_v5 }
0x1468   :  { %v3194_v8 = vpop.eup %3193 }
0x1469   :  { %v2422_v10 = vadd.f32 %v3194_v8, %v3192_v7 }
0x146b   :  { %v3196_v14 = vpop.eup %3195  ;;  %2423 = vadd.xlane.f32.xlu0 %v2422_v10 }
0x146c   :  { %v3198_v20 = vpop.eup %3197 }
0x146d   :  { %v2425_v23 = vadd.f32 %v3198_v20, %v3196_v14 }
0x146f   :  { %2469 = vadd.xlane.f32.xlu0 %v2468_v18  ;;  %2426 = vadd.xlane.f32.xlu1 %v2425_v23 }
0x1473   :  { %2457 = vadd.xlane.f32.xlu0 %v2456_v27  ;;  %2472 = vadd.xlane.f32.xlu1 %v2471_v30 }
0x1477   :  { %2460 = vadd.xlane.f32.xlu1 %v2459_v33  ;;  %2475 = vadd.xlane.f32.xlu0 %v2474_v34 }
0x147b   :  { %2463 = vadd.xlane.f32.xlu1 %v2462_v41  ;;  %2478 = vadd.xlane.f32.xlu0 %v2477_v38 }
0x147f   :  { %2466 = vadd.xlane.f32.xlu1 %v2465_v2 }
0x14ec   :  { %v2418_v43 = vpop.xlane.xlu0 %2417 }
0x14ed   :  { %3199 = vlog2.f32 %v2418_v43 }
0x14f0   :  { %v2421_v35 = vpop.xlane.xlu1 %2420 }
0x14f1   :  { %3201 = vlog2.f32 %v2421_v35 }
0x14f4   :  { %v2424_v21 = vpop.xlane.xlu0 %2423 }
0x14f5   :  { %3203 = vlog2.f32 %v2424_v21 }
0x14f8   :  { %v2470_v54 = vpop.xlane.xlu0 %2469  ;;  %v2427_v58 = vpop.xlane.xlu1 %2426 }
0x14f9   :  { %3205 = vlog2.f32 %v2427_v58 }
0x14fa   :  { %v3200_v44 = vpop.eup %3199 }
0x14fb   :  { %v2429_v60 = vmul.f32 0.6931472, %v3200_v44 }
0x14fc   :  { %v2473_v46 = vpop.xlane.xlu1 %2472  ;;  %v2458_v42 = vpop.xlane.xlu0 %2457 }
0x14fd   :  { %v2436_v45 = vadd.f32 %v2429_v60, %v3877_v47 }
0x14fe   :  { %v3202_v57 = vpop.eup %3201 }
0x14ff   :  { %v2431_v48 = vmul.f32 0.6931472, %v3202_v57  ;;  %v2480_v55 = vmul.f32 %v2470_v54, %v2436_v45 }
0x1500   :  { %v2461_v50 = vpop.xlane.xlu1 %2460  ;;  %v2476_v16 = vpop.xlane.xlu0 %2475 }
0x1501   :  { %v2437_v51 = vadd.f32 %v2431_v48, %v3882_v49  ;;  %v2484_v37 = vsub.f32 %v2480_v55, %v2458_v42 }
0x1502   :  { %v3204_v13 = vpop.eup %3203 }
0x1503   :  { %v2433_v19 = vmul.f32 0.6931472, %v3204_v13  ;;  %v2481_v9 = vmul.f32 %v2473_v46, %v2437_v51  ;;  %v2489_v49 = vsel %vm2488_vm2, %v2484_v37, 0.0 }
0x1504   :  { %v2464_v63 = vpop.xlane.xlu1 %2463  ;;  %v2479_v62 = vpop.xlane.xlu0 %2478 }
0x1505   :  { %v2485_v56 = vsub.f32 %v2481_v9, %v2461_v50  ;;  %v2438_v22 = vadd.f32 %v2433_v19, %v3888_v17 }
0x1506   :  { %v3206_v36 = vpop.eup %3205 }
0x1507   :  { %v2435_v29 = vmul.f32 0.6931472, %v3206_v36  ;;  %v2482_v61 = vmul.f32 %v2476_v16, %v2438_v22  ;;  %v2490_v3 = vsel %vm2488_vm2, %v2485_v56, 0.0 }
0x1508   :  { %v2491_v8 = vadd.f32 %v2490_v3, %v2489_v49  ;;  %v2467_v10 = vpop.xlane.xlu1 %2466 }
0x1509   :  { %v2486_v47 = vsub.f32 %v2482_v61, %v2464_v63  ;;  %v2439_v4 = vadd.f32 %v2435_v29, %v3894_v59 }
0x150b   :  { %v2483_v5 = vmul.f32 %v2479_v62, %v2439_v4  ;;  %v2492_v7 = vsel %vm2488_vm2, %v2486_v47, 0.0 }
0x150c   :  { %v2493_v12 = vadd.f32 %v2492_v7, %v2491_v8 }
0x150d   :  { %v2487_v11 = vsub.f32 %v2483_v5, %v2467_v10 }
0x150f   :  { %v2494_v14 = vsel %vm2488_vm2, %v2487_v11, 0.0 }
0x1510   :  { %v2495_v17 = vadd.f32 %v2494_v14, %v2493_v12 }
0x1512   :  { %2496 = vadd.xlane.f32.xlu0 %v2495_v17 }
0x159b   :  { %v2497_v18 = vpop.xlane.xlu0 %2496 }
0x159c   :  { %v2498_v20 = vrot.slane %v2497_v18, 4 }
0x159e   :  { %v2499_v23 = vadd.f32 %v2498_v20, %v2497_v18 }
0x15a0   :  { %v2500_v24 = vrot.slane %v2499_v23, 2 }
0x15a2   :  { %v2501_v25 = vadd.f32 %v2500_v24, %v2499_v23 }
0x15a4   :  { %v2502_v31 = vrot.slane %v2501_v25, 1 }
0x15a6   :  { %v2503_v32 = vadd.f32 %v2502_v31, %v2501_v25 }
0x15a8   :  { %2943 = vpush %v2503_v32 }
0x15d9   :  { %s2944_s9 = spop %2943 }
0x15da   :  { %v2505_v59 = vstv %s2944_s9 }
0x15db   :  { %2507 = vst.msk [vmem:[#allocation8] sm:$0x1] %vm2506_vm3, %v2505_v59 }
0x15dc   :  { %3279 = shalt.err (!%p3276_p5)
}
0x15dd   :  { %2517 = dma.vmem_to_hbm [thread:$0]  %s2515_s30, 16, %s3946_s8, [#allocation4]  }
0x15de   :  { %3292 = dma.done.wait [#allocation4], 16  }
0x15df   :  { %3293 = vsyncadd [#allocation4], 4294967280 }
0x15e0   :  { %2521 = vsyncpa [#allocation3], 1 }
0x15e1   :  { %2522 = vsyncpa [#allocation6], 1 }
0x15e2   :  { %2523 = vsyncpa [#allocation4], 1 }

</bundles_post_ra>
